<compile_context>
chip_gen: v7x
topology: tpu7x:2x2x1
jax: 0.10.0
libtpu: 0.0.40
codegen_flags: <defaults>
</compile_context>

<pallas_src>
import functools
import math

import jax
import jax.numpy as jnp
from jax.experimental import pallas as pl
from jax.experimental.pallas import tpu as pltpu


# ----------------------------- small math helpers -----------------------------

def _gelu(x):
    # tanh-approximate GELU (used both in-kernel and in the pure-JAX reference)
    return 0.5 * x * (1.0 + jnp.tanh(0.7978845608028654 * (x + 0.044715 * x * x * x)))


def _layernorm(x, gamma, beta, eps=1e-12):
    mu = jnp.mean(x, axis=-1, keepdims=True)
    var = jnp.mean((x - mu) ** 2, axis=-1, keepdims=True)
    return (x - mu) * jax.lax.rsqrt(var + eps) * gamma + beta


# ----------------------------- Pallas kernel -----------------------------------

def bert_stack_kernel(x_ref, bias_ref, wqkv_ref, bqkv_ref, wattn_ref, battn_ref,
                      wi_ref, bi_ref, wo_ref, bo_ref, ln_ref, out_ref, h_scr,
                      *, num_heads):
    """Full BERT encoder stack.

    grid = (batch_tile, layer).  The whole batch tile's residual stream lives in
    a f32 VMEM scratch across the layer axis, so activations cross HBM only once
    per batch tile and each layer's weights are streamed once per batch tile.
    """
    l = pl.program_id(1)

    # Load the embedded tokens into the persistent residual-stream scratch once
    # per batch tile (layer axis is the inner, "arbitrary" grid axis).
    @pl.when(l == 0)
    def _():
        h_scr[...] = x_ref[...].astype(jnp.float32)

    h = h_scr[...]                                   # (Bt, S, H) f32 residual stream
    Bt, S, H = h.shape
    nh = num_heads
    hd = H // nh
    scale = 1.0 / math.sqrt(hd)
    bias = bias_ref[...]                             # (Bt, 1, S) additive -1e4 mask

    h_flat = h.reshape(Bt * S, H)
    hb = h_flat.astype(jnp.bfloat16)

    # ---- fused lane-dense QKV projection: (Bt*S, H) @ (H, 3H) ------------------
    qkv = jnp.dot(hb, wqkv_ref[0], preferred_element_type=jnp.float32) + bqkv_ref[0]
    qkv = qkv.astype(jnp.bfloat16).reshape(Bt, S, 3 * H)   # [Q | K | V], head-major

    # ---- multi-head attention: per-head lane slices, no (3nh,S,H) replicas ----
    ctx_heads = []
    for n in range(nh):
        q_n = qkv[:, :, n * hd:(n + 1) * hd]                   # (Bt, S, hd) bf16
        k_n = qkv[:, :, H + n * hd:H + (n + 1) * hd]
        v_n = qkv[:, :, 2 * H + n * hd:2 * H + (n + 1) * hd]

        s_n = jnp.einsum("bqd,bkd->bqk", q_n, k_n,
                         preferred_element_type=jnp.float32) * scale + bias  # (Bt,S,S) f32
        s_n = s_n - jnp.max(s_n, axis=-1, keepdims=True)
        p_n = jnp.exp(s_n)
        p_n = (p_n * pl.reciprocal(jnp.sum(p_n, axis=-1, keepdims=True),
                                   approx=True)).astype(jnp.bfloat16)
        ctx_heads.append(
            jnp.einsum("bqk,bkd->bqd", p_n, v_n,
                       preferred_element_type=jnp.float32).astype(jnp.bfloat16))

    # lane-dense (Bt*S, H) context slab -> single output projection with K = H
    ctx = jnp.concatenate(ctx_heads, axis=-1).reshape(Bt * S, H)
    attn_out = jnp.dot(ctx, wattn_ref[0],
                       preferred_element_type=jnp.float32) + battn_ref[0]    # (Bt*S, H)

    ln = ln_ref[0]                                   # (4, H) f32
    h1 = _layernorm(attn_out + h_flat, ln[0:1], ln[1:2])

    # ---- FFN ------------------------------------------------------------------
    inter = _gelu(jnp.dot(h1.astype(jnp.bfloat16), wi_ref[0],
                          preferred_element_type=jnp.float32) + bi_ref[0])
    ffn = jnp.dot(inter.astype(jnp.bfloat16), wo_ref[0],
                  preferred_element_type=jnp.float32) + bo_ref[0]
    h2 = _layernorm(ffn + h1, ln[2:3], ln[3:4])

    h_scr[...] = h2.reshape(Bt, S, H)

    @pl.when(l == pl.num_programs(1) - 1)
    def _():
        out_ref[...] = h2.reshape(Bt, S, H).astype(out_ref.dtype)


# ----------------------------- Pallas wrapper -----------------------------------

def _pick_vmem_limit():
    """~85% of physical VMEM (capped at 112 MiB): v7x≈54 MiB, v5e/v6e≈108 MiB."""
    try:
        cap = int(pltpu.get_tpu_info().vmem_capacity_bytes)
    except Exception:
        cap = 128 * 1024 * 1024
    return min(int(cap * 0.85), 112 * 1024 * 1024)


def run_bert_encoder(x_emb, attn_bias, enc, num_heads, batch_tile=None):
    B, S, H = x_emb.shape
    L = enc["wqkv"].shape[0]
    I = enc["wi"].shape[-1]
    Bt = B if batch_tile is None else batch_tile
    assert B % Bt == 0, "batch must divide into batch tiles"

    kern = functools.partial(bert_stack_kernel, num_heads=num_heads)
    grid_spec = pltpu.PrefetchScalarGridSpec(
        num_scalar_prefetch=0,
        grid=(B // Bt, L),
        in_specs=[
            pl.BlockSpec((Bt, S, H), lambda b, l: (b, 0, 0)),        # embeddings (bf16)
            pl.BlockSpec((Bt, 1, S), lambda b, l: (b, 0, 0)),        # attention bias (f32)
            pl.BlockSpec((1, H, 3 * H), lambda b, l: (l, 0, 0)),     # fused W_qkv (bf16)
            pl.BlockSpec((1, 1, 3 * H), lambda b, l: (l, 0, 0)),     # fused b_qkv (lane-dense)
            pl.BlockSpec((1, H, H), lambda b, l: (l, 0, 0)),         # attn output W (bf16)
            pl.BlockSpec((1, 1, H), lambda b, l: (l, 0, 0)),         # attn output b
            pl.BlockSpec((1, H, I), lambda b, l: (l, 0, 0)),         # FFN intermediate W
            pl.BlockSpec((1, 1, I), lambda b, l: (l, 0, 0)),         # FFN intermediate b
            pl.BlockSpec((1, I, H), lambda b, l: (l, 0, 0)),         # FFN output W
            pl.BlockSpec((1, 1, H), lambda b, l: (l, 0, 0)),         # FFN output b
            pl.BlockSpec((1, 4, H), lambda b, l: (l, 0, 0)),         # ln1_g, ln1_b, ln2_g, ln2_b
        ],
        out_specs=pl.BlockSpec((Bt, S, H), lambda b, l: (b, 0, 0)),
        scratch_shapes=[pltpu.VMEM((Bt, S, H), jnp.float32)],        # residual stream
    )
    return pl.pallas_call(
        kern,
        out_shape=jax.ShapeDtypeStruct((B, S, H), jnp.bfloat16),     # bf16 writeback
        grid_spec=grid_spec,
        compiler_params=pltpu.CompilerParams(
            dimension_semantics=("parallel", "arbitrary"),
            vmem_limit_bytes=_pick_vmem_limit()),
    )(x_emb, attn_bias, enc["wqkv"], enc["bqkv"], enc["wattn"], enc["battn"],
      enc["wi"], enc["bi"], enc["wo"], enc["bo"], enc["ln"])


# ----------------------------- model glue (plain JAX) ----------------------------

def bert_embed(params, x, segs):
    B, S = x.shape
    pos = jnp.arange(S)
    e = params["word_emb"][x] + params["pos_emb"][pos][None, :, :] + params["type_emb"][segs]
    return _layernorm(e, params["emb_ln_g"], params["emb_ln_b"])


def prep_encoder_params(params):
    """Stack per-layer weights into the fused, lane-dense bf16 kernel layout."""
    acc = {k: [] for k in ("wqkv", "bqkv", "wattn", "battn", "wi", "bi", "wo", "bo", "ln")}
    for lp in params["layers"]:
        w4, b4 = lp["wqkvo"], lp["bqkvo"]                    # (4,H,H), (4,H)
        H = w4.shape[-1]
        # fused QKV: output columns ordered [Q | K | V], head-major inside each
        acc["wqkv"].append(jnp.concatenate([w4[0], w4[1], w4[2]], axis=1).astype(jnp.bfloat16))
        acc["bqkv"].append(b4[:3].reshape(1, 3 * H))
        acc["wattn"].append(w4[3].astype(jnp.bfloat16))      # (H, H)
        acc["battn"].append(b4[3].reshape(1, H))
        acc["wi"].append(lp["wi"].astype(jnp.bfloat16))
        acc["bi"].append(lp["bi"])
        acc["wo"].append(lp["wo"].astype(jnp.bfloat16))
        acc["bo"].append(lp["bo"])
        acc["ln"].append(lp["ln"])
    return {k: jnp.stack(v, axis=0) for k, v in acc.items()}


def summarizer_forward(params, enc, x, segs, clss, mask, mask_cls):
    # --- BERT encoder: top_vec = self.bert(x, segs, mask) ---
    h0 = bert_embed(params, x, segs)                                   # f32
    x_emb = h0.astype(jnp.bfloat16)                                    # halves HBM traffic
    attn_bias = (1.0 - mask.astype(jnp.float32))[:, None, :] * -10000.0
    top_bf16 = run_bert_encoder(x_emb, attn_bias, enc, params["num_heads"])

    # --- clss gather + Classifier, fused in plain JAX (lane-sparse output, ~B*N*H flops) ---
    B = x.shape[0]
    mcf = mask_cls.astype(jnp.float32)
    sents_vec = top_bf16[jnp.arange(B)[:, None], clss] * mcf[:, :, None]   # f32 via promotion
    logits = jnp.einsum("bnh,h->bn", sents_vec, params["cls_w"][0]) + params["cls_b"][0, 0]
    sent_scores = jax.nn.sigmoid(logits) * mcf
    top_vec = top_bf16.astype(jnp.float32)   # module returns a float tensor
    return sent_scores, mask_cls, top_vec
# TODO(synk): BertTokenizer / LDA topic loading and the Memory / Key_memory /
# Topic_predictor sub-modules are built in __init__ but never used in forward();
# they are intentionally not ported.


# ----------------------------- pure-JAX reference --------------------------------
# Mirrors the kernel's mixed-precision policy (bf16 matmul inputs, f32 accumulation,
# f32 LayerNorm/softmax statistics) so the comparison is apples-to-apples.

def reference_forward(params, x, segs, clss, mask, mask_cls):
    nh = params["num_heads"]
    h = bert_embed(params, x, segs).astype(jnp.bfloat16).astype(jnp.float32)
    bias = (1.0 - mask.astype(jnp.float32))[:, None, :] * -10000.0
    for lp in params["layers"]:
        B, S, H = h.shape
        hd = H // nh
        w = lp["wqkvo"].astype(jnp.bfloat16)
        hb = h.astype(jnp.bfloat16)
        q = jnp.einsum("bsh,hk->bsk", hb, w[0], preferred_element_type=jnp.float32) + lp["bqkvo"][0]
        k = jnp.einsum("bsh,hk->bsk", hb, w[1], preferred_element_type=jnp.float32) + lp["bqkvo"][1]
        v = jnp.einsum("bsh,hk->bsk", hb, w[2], preferred_element_type=jnp.float32) + lp["bqkvo"][2]
        qh = q.reshape(B, S, nh, hd).transpose(0, 2, 1, 3).astype(jnp.bfloat16)
        kh = k.reshape(B, S, nh, hd).transpose(0, 2, 1, 3).astype(jnp.bfloat16)
        vh = v.reshape(B, S, nh, hd).transpose(0, 2, 1, 3).astype(jnp.bfloat16)
        s = jnp.einsum("bhqd,bhkd->bhqk", qh, kh,
                       preferred_element_type=jnp.float32) / math.sqrt(hd) + bias[:, None, :, :]
        p = jax.nn.softmax(s, axis=-1)
        ctx = jnp.einsum("bhqk,bhkd->bhqd", p.astype(jnp.bfloat16), vh,
                         preferred_element_type=jnp.float32)
        ctx = ctx.transpose(0, 2, 1, 3).reshape(B, S, H)
        attn_out = jnp.einsum("bsh,hk->bsk", ctx.astype(jnp.bfloat16), w[3],
                              preferred_element_type=jnp.float32) + lp["bqkvo"][3]
        h1 = _layernorm(attn_out + h, lp["ln"][0], lp["ln"][1])
        inter = _gelu(jnp.einsum("bsh,hi->bsi", h1.astype(jnp.bfloat16),
                                 lp["wi"].astype(jnp.bfloat16),
                                 preferred_element_type=jnp.float32) + lp["bi"])
        ffn = jnp.einsum("bsi,ih->bsh", inter.astype(jnp.bfloat16),
                         lp["wo"].astype(jnp.bfloat16),
                         preferred_element_type=jnp.float32) + lp["bo"]
        h = _layernorm(ffn + h1, lp["ln"][2], lp["ln"][3])
    top_vec = h
    B = x.shape[0]
    mcf = mask_cls.astype(jnp.float32)
    sv = top_vec[jnp.arange(B)[:, None], clss] * mcf[:, :, None]
    logits = jnp.einsum("bnh,h->bn", sv, params["cls_w"][0]) + params["cls_b"][0, 0]
    scores = jax.nn.sigmoid(logits) * mcf
    return scores, mask_cls, top_vec


# ----------------------------- param init ---------------------------------------

def init_params(key, vocab, max_pos, H, I, num_layers, num_heads):
    keys = iter(jax.random.split(key, 8 + 6 * num_layers))
    std = 0.02
    params = {
        "num_heads": num_heads,
        "word_emb": std * jax.random.normal(next(keys), (vocab, H), jnp.float32),
        "pos_emb": std * jax.random.normal(next(keys), (max_pos, H), jnp.float32),
        "type_emb": std * jax.random.normal(next(keys), (2, H), jnp.float32),
        "emb_ln_g": jnp.ones((H,), jnp.float32),
        "emb_ln_b": jnp.zeros((H,), jnp.float32),
        "cls_w": std * jax.random.normal(next(keys), (1, H), jnp.float32),
        "cls_b": std * jax.random.normal(next(keys), (1, 1), jnp.float32),
        "layers": [],
    }
    for _ in range(num_layers):
        lp = {
            "wqkvo": std * jax.random.normal(next(keys), (4, H, H), jnp.float32),
            "bqkvo": std * jax.random.normal(next(keys), (4, H), jnp.float32),
            "wi": std * jax.random.normal(next(keys), (H, I), jnp.float32),
            "bi": std * jax.random.normal(next(keys), (1, I), jnp.float32),
            "wo": std * jax.random.normal(next(keys), (I, H), jnp.float32),
            "bo": std * jax.random.normal(next(keys), (1, H), jnp.float32),
            # [ln1_gamma, ln1_beta, ln2_gamma, ln2_beta]
            "ln": jnp.stack([jnp.ones((H,)), jnp.zeros((H,)),
                             jnp.ones((H,)), jnp.zeros((H,))]).astype(jnp.float32),
        }
        params["layers"].append(lp)
    return params


# ----------------------------- main ----------------------------------------------

if __name__ == "__main__":
    B, S, H = 2, 16, 32          # batch, sequence length, hidden size
    num_heads, I, L = 2, 64, 2   # heads, FFN intermediate, layers
    V, N = 64, 4                 # vocab size, number of sentences (clss positions)

    key = jax.random.PRNGKey(0)
    k_param, k_x, k_seg = jax.random.split(key, 3)

    params = init_params(k_param, V, S, H, I, L, num_heads)
    enc = prep_encoder_params(params)    # fused bf16 kernel layout, stacked over layers

    x = jax.random.randint(k_x, (B, S), 0, V, dtype=jnp.int32)
    segs = jnp.concatenate(
        [jnp.zeros((B, S // 2), jnp.int32), jnp.ones((B, S // 2), jnp.int32)], axis=1)
    mask = jnp.array([[1] * S, [1] * (S - 4) + [0] * 4], dtype=jnp.int32)       # attention mask
    clss = jnp.array([[0, 4, 8, 12], [0, 3, 6, 9]], dtype=jnp.int32)            # [CLS] positions
    mask_cls = jnp.array([[1, 1, 1, 1], [1, 1, 1, 0]], dtype=jnp.int32)

    sent_scores, mask_cls_out, top_vec = summarizer_forward(
        params, enc, x, segs, clss, mask, mask_cls)
    jax.block_until_ready((sent_scores, mask_cls_out, top_vec))

    # correctness check against a pure-JAX reference with matching precision policy
    ref_scores, _, ref_top = reference_forward(params, x, segs, clss, mask, mask_cls)
    assert jnp.allclose(top_vec, ref_top, rtol=1e-2, atol=1e-2), "top_vec mismatch"
    assert jnp.allclose(sent_scores, ref_scores, rtol=1e-2, atol=1e-2), "sent_scores mismatch"
    assert sent_scores.shape == (B, N) and top_vec.shape == (B, S, H)

    print("KERNEL_OK")
</pallas_src>

<mosaic_0001>
module attributes {stable_mosaic.version = 11 : i64} {
  func.func @bert_stack_kernel(%arg0: i32, %arg1: i32, %arg2: memref<2x16x32xbf16, #tpu.memory_space<vmem>>, %arg3: memref<2x1x16xf32, #tpu.memory_space<vmem>>, %arg4: memref<1x32x96xbf16, #tpu.memory_space<vmem>>, %arg5: memref<1x1x96xf32, #tpu.memory_space<vmem>>, %arg6: memref<1x32x32xbf16, #tpu.memory_space<vmem>>, %arg7: memref<1x1x32xf32, #tpu.memory_space<vmem>>, %arg8: memref<1x32x64xbf16, #tpu.memory_space<vmem>>, %arg9: memref<1x1x64xf32, #tpu.memory_space<vmem>>, %arg10: memref<1x64x32xbf16, #tpu.memory_space<vmem>>, %arg11: memref<1x1x32xf32, #tpu.memory_space<vmem>>, %arg12: memref<1x4x32xf32, #tpu.memory_space<vmem>>, %arg13: memref<2x16x32xbf16, #tpu.memory_space<vmem>>, %arg14: memref<2x16x32xf32, #tpu.memory_space<vmem>>) attributes {dimension_semantics = [#tpu.dimension_semantics<parallel>, #tpu.dimension_semantics<arbitrary>], iteration_bounds = array<i64: 1, 2>, scalar_prefetch = 0 : i64, scratch_operands = 1 : i64, tpu.core_type = #tpu.core_type<tc>, window_params = [{transform_indices = @transform_0, window_bounds = array<i64: 2, 16, 32>}, {transform_indices = @transform_1, window_bounds = array<i64: 2, 1, 16>}, {transform_indices = @transform_2, window_bounds = array<i64: 1, 32, 96>}, {transform_indices = @transform_3, window_bounds = array<i64: 1, 1, 96>}, {transform_indices = @transform_4, window_bounds = array<i64: 1, 32, 32>}, {transform_indices = @transform_5, window_bounds = array<i64: 1, 1, 32>}, {transform_indices = @transform_6, window_bounds = array<i64: 1, 32, 64>}, {transform_indices = @transform_7, window_bounds = array<i64: 1, 1, 64>}, {transform_indices = @transform_8, window_bounds = array<i64: 1, 64, 32>}, {transform_indices = @transform_9, window_bounds = array<i64: 1, 1, 32>}, {transform_indices = @transform_10, window_bounds = array<i64: 1, 4, 32>}, {transform_indices = @transform_11, window_bounds = array<i64: 2, 16, 32>}]} {
    %c0_i32 = arith.constant 0 : i32
    %0 = arith.cmpi eq, %arg1, %c0_i32 : i32
    %1 = arith.extui %0 : i1 to i32
    %c0_i32_0 = arith.constant 0 : i32
    %2 = arith.cmpi ne, %1, %c0_i32_0 : i32
    scf.if %2 {
      %c0_64 = arith.constant 0 : index
      %c0_65 = arith.constant 0 : index
      %c0_66 = arith.constant 0 : index
      %153 = vector.load %arg2[%c0_64, %c0_65, %c0_66] : memref<2x16x32xbf16, #tpu.memory_space<vmem>>, vector<2x16x32xbf16>
      %154 = arith.extf %153 : vector<2x16x32xbf16> to vector<2x16x32xf32>
      %c0_67 = arith.constant 0 : index
      %c0_68 = arith.constant 0 : index
      %c0_69 = arith.constant 0 : index
      %155 = vector.load %arg14[%c0_67, %c0_68, %c0_69] : memref<2x16x32xf32, #tpu.memory_space<vmem>>, vector<2x16x32xf32>
      tpu.vector_store %arg14[%c0_67, %c0_68, %c0_69], %154 {strides = array<i32>} : memref<2x16x32xf32, #tpu.memory_space<vmem>>, vector<2x16x32xf32>,
    } else {
    }
    %c0 = arith.constant 0 : index
    %c0_1 = arith.constant 0 : index
    %c0_2 = arith.constant 0 : index
    %3 = vector.load %arg14[%c0, %c0_1, %c0_2] : memref<2x16x32xf32, #tpu.memory_space<vmem>>, vector<2x16x32xf32>
    %c0_3 = arith.constant 0 : index
    %c0_4 = arith.constant 0 : index
    %c0_5 = arith.constant 0 : index
    %4 = vector.load %arg3[%c0_3, %c0_4, %c0_5] : memref<2x1x16xf32, #tpu.memory_space<vmem>>, vector<2x1x16xf32>
    %5 = vector.shape_cast %3 : vector<2x16x32xf32> to vector<32x32xf32>
    %6 = arith.truncf %5 : vector<32x32xf32> to vector<32x32xbf16>
    %c0_6 = arith.constant 0 : index
    %c0_7 = arith.constant 0 : index
    %c0_8 = arith.constant 0 : index
    %7 = vector.load %arg4[%c0_6, %c0_7, %c0_8] : memref<1x32x96xbf16, #tpu.memory_space<vmem>>, vector<1x32x96xbf16>
    %8 = vector.shape_cast %7 : vector<1x32x96xbf16> to vector<32x96xbf16>
    %cst = arith.constant dense<0.000000e+00> : vector<32x96xf32>
    %9 = tpu.matmul %6, %8, %cst {dimension_numbers = #tpu.dot_dimension_numbers<[1], [0], [0], [1], [0, 0, 1, 1], [], []>} : vector<32x32xbf16>, vector<32x96xbf16>, vector<32x96xf32> -> vector<32x96xf32>
    %c0_9 = arith.constant 0 : index
    %c0_10 = arith.constant 0 : index
    %c0_11 = arith.constant 0 : index
    %10 = vector.load %arg5[%c0_9, %c0_10, %c0_11] : memref<1x1x96xf32, #tpu.memory_space<vmem>>, vector<1x1x96xf32>
    %11 = vector.shape_cast %10 : vector<1x1x96xf32> to vector<1x96xf32>
    %12 = vector.broadcast %11 : vector<1x96xf32> to vector<32x96xf32>
    %13 = arith.addf %9, %12 : vector<32x96xf32>
    %14 = arith.truncf %13 : vector<32x96xf32> to vector<32x96xbf16>
    %15 = vector.shape_cast %14 : vector<32x96xbf16> to vector<2x16x96xbf16>
    %16 = vector.extract_strided_slice %15 {offsets = [0, 0, 0], sizes = [2, 16, 16], strides = [1, 1, 1]} : vector<2x16x96xbf16> to vector<2x16x16xbf16>
    %17 = vector.extract_strided_slice %15 {offsets = [0, 0, 32], sizes = [2, 16, 16], strides = [1, 1, 1]} : vector<2x16x96xbf16> to vector<2x16x16xbf16>
    %18 = vector.extract_strided_slice %15 {offsets = [0, 0, 64], sizes = [2, 16, 16], strides = [1, 1, 1]} : vector<2x16x96xbf16> to vector<2x16x16xbf16>
    "tpu.trace_start"() <{level = 10 : i32, message = "bqd,bkd->bqk"}> : () -> ()
    %cst_12 = arith.constant dense<0.000000e+00> : vector<2x16x16xf32>
    %19 = tpu.matmul %16, %17, %cst_12 {dimension_numbers = #tpu.dot_dimension_numbers<[2], [2], [1], [1], [0, 0, 0, 1, 1, 1], [0], [0]>} : vector<2x16x16xbf16>, vector<2x16x16xbf16>, vector<2x16x16xf32> -> vector<2x16x16xf32>
    "tpu.trace_stop"() : () -> ()
    %cst_13 = arith.constant 2.500000e-01 : f32
    %20 = vector.broadcast %cst_13 : f32 to vector<2x16x16xf32>
    %21 = arith.mulf %19, %20 : vector<2x16x16xf32>
    %22 = vector.broadcast %4 : vector<2x1x16xf32> to vector<2x16x16xf32>
    %23 = arith.addf %21, %22 : vector<2x16x16xf32>
    %cst_14 = arith.constant dense<0xFF800000> : vector<2x16xf32>
    %24 = vector.multi_reduction <maximumf>, %23, %cst_14 [2] : vector<2x16x16xf32> to vector<2x16xf32>
    %25 = vector.shape_cast %24 : vector<2x16xf32> to vector<2x16x1xf32>
    %26 = vector.broadcast %25 : vector<2x16x1xf32> to vector<2x16x16xf32>
    %27 = arith.subf %23, %26 : vector<2x16x16xf32>
    %28 = math.exp %27 : vector<2x16x16xf32>
    %cst_15 = arith.constant dense<0.000000e+00> : vector<2x16xf32>
    %29 = vector.multi_reduction <add>, %28, %cst_15 [2] : vector<2x16x16xf32> to vector<2x16xf32>
    %30 = vector.shape_cast %29 : vector<2x16xf32> to vector<2x16x1xf32>
    %31 = tpu.reciprocal %30 {approx = true} : vector<2x16x1xf32> -> vector<2x16x1xf32>
    %32 = vector.broadcast %31 : vector<2x16x1xf32> to vector<2x16x16xf32>
    %33 = arith.mulf %28, %32 : vector<2x16x16xf32>
    %34 = arith.truncf %33 : vector<2x16x16xf32> to vector<2x16x16xbf16>
    "tpu.trace_start"() <{level = 10 : i32, message = "bqk,bkd->bqd"}> : () -> ()
    %cst_16 = arith.constant dense<0.000000e+00> : vector<2x16x16xf32>
    %35 = tpu.matmul %34, %18, %cst_16 {dimension_numbers = #tpu.dot_dimension_numbers<[2], [1], [1], [2], [0, 0, 0, 1, 1, 2], [0], [0]>} : vector<2x16x16xbf16>, vector<2x16x16xbf16>, vector<2x16x16xf32> -> vector<2x16x16xf32>
    "tpu.trace_stop"() : () -> ()
    %36 = arith.truncf %35 : vector<2x16x16xf32> to vector<2x16x16xbf16>
    %37 = vector.extract_strided_slice %15 {offsets = [0, 0, 16], sizes = [2, 16, 16], strides = [1, 1, 1]} : vector<2x16x96xbf16> to vector<2x16x16xbf16>
    %38 = vector.extract_strided_slice %15 {offsets = [0, 0, 48], sizes = [2, 16, 16], strides = [1, 1, 1]} : vector<2x16x96xbf16> to vector<2x16x16xbf16>
    %39 = vector.extract_strided_slice %15 {offsets = [0, 0, 80], sizes = [2, 16, 16], strides = [1, 1, 1]} : vector<2x16x96xbf16> to vector<2x16x16xbf16>
    "tpu.trace_start"() <{level = 10 : i32, message = "bqd,bkd->bqk"}> : () -> ()
    %cst_17 = arith.constant dense<0.000000e+00> : vector<2x16x16xf32>
    %40 = tpu.matmul %37, %38, %cst_17 {dimension_numbers = #tpu.dot_dimension_numbers<[2], [2], [1], [1], [0, 0, 0, 1, 1, 1], [0], [0]>} : vector<2x16x16xbf16>, vector<2x16x16xbf16>, vector<2x16x16xf32> -> vector<2x16x16xf32>
    "tpu.trace_stop"() : () -> ()
    %cst_18 = arith.constant 2.500000e-01 : f32
    %41 = vector.broadcast %cst_18 : f32 to vector<2x16x16xf32>
    %42 = arith.mulf %40, %41 : vector<2x16x16xf32>
    %43 = vector.broadcast %4 : vector<2x1x16xf32> to vector<2x16x16xf32>
    %44 = arith.addf %42, %43 : vector<2x16x16xf32>
    %cst_19 = arith.constant dense<0xFF800000> : vector<2x16xf32>
    %45 = vector.multi_reduction <maximumf>, %44, %cst_19 [2] : vector<2x16x16xf32> to vector<2x16xf32>
    %46 = vector.shape_cast %45 : vector<2x16xf32> to vector<2x16x1xf32>
    %47 = vector.broadcast %46 : vector<2x16x1xf32> to vector<2x16x16xf32>
    %48 = arith.subf %44, %47 : vector<2x16x16xf32>
    %49 = math.exp %48 : vector<2x16x16xf32>
    %cst_20 = arith.constant dense<0.000000e+00> : vector<2x16xf32>
    %50 = vector.multi_reduction <add>, %49, %cst_20 [2] : vector<2x16x16xf32> to vector<2x16xf32>
    %51 = vector.shape_cast %50 : vector<2x16xf32> to vector<2x16x1xf32>
    %52 = tpu.reciprocal %51 {approx = true} : vector<2x16x1xf32> -> vector<2x16x1xf32>
    %53 = vector.broadcast %52 : vector<2x16x1xf32> to vector<2x16x16xf32>
    %54 = arith.mulf %49, %53 : vector<2x16x16xf32>
    %55 = arith.truncf %54 : vector<2x16x16xf32> to vector<2x16x16xbf16>
    "tpu.trace_start"() <{level = 10 : i32, message = "bqk,bkd->bqd"}> : () -> ()
    %cst_21 = arith.constant dense<0.000000e+00> : vector<2x16x16xf32>
    %56 = tpu.matmul %55, %39, %cst_21 {dimension_numbers = #tpu.dot_dimension_numbers<[2], [1], [1], [2], [0, 0, 0, 1, 1, 2], [0], [0]>} : vector<2x16x16xbf16>, vector<2x16x16xbf16>, vector<2x16x16xf32> -> vector<2x16x16xf32>
    "tpu.trace_stop"() : () -> ()
    %57 = arith.truncf %56 : vector<2x16x16xf32> to vector<2x16x16xbf16>
    %58 = tpu.concatenate %36, %57 in 2 : vector<2x16x16xbf16>, vector<2x16x16xbf16> -> vector<2x16x32xbf16>
    %59 = vector.shape_cast %58 : vector<2x16x32xbf16> to vector<32x32xbf16>
    %c0_22 = arith.constant 0 : index
    %c0_23 = arith.constant 0 : index
    %c0_24 = arith.constant 0 : index
    %60 = vector.load %arg6[%c0_22, %c0_23, %c0_24] : memref<1x32x32xbf16, #tpu.memory_space<vmem>>, vector<1x32x32xbf16>
    %61 = vector.shape_cast %60 : vector<1x32x32xbf16> to vector<32x32xbf16>
    %cst_25 = arith.constant dense<0.000000e+00> : vector<32x32xf32>
    %62 = tpu.matmul %59, %61, %cst_25 {dimension_numbers = #tpu.dot_dimension_numbers<[1], [0], [0], [1], [0, 0, 1, 1], [], []>} : vector<32x32xbf16>, vector<32x32xbf16>, vector<32x32xf32> -> vector<32x32xf32>
    %c0_26 = arith.constant 0 : index
    %c0_27 = arith.constant 0 : index
    %c0_28 = arith.constant 0 : index
    %63 = vector.load %arg7[%c0_26, %c0_27, %c0_28] : memref<1x1x32xf32, #tpu.memory_space<vmem>>, vector<1x1x32xf32>
    %64 = vector.shape_cast %63 : vector<1x1x32xf32> to vector<1x32xf32>
    %65 = vector.broadcast %64 : vector<1x32xf32> to vector<32x32xf32>
    %66 = arith.addf %62, %65 : vector<32x32xf32>
    %c0_29 = arith.constant 0 : index
    %c0_30 = arith.constant 0 : index
    %c0_31 = arith.constant 0 : index
    %67 = vector.load %arg12[%c0_29, %c0_30, %c0_31] : memref<1x4x32xf32, #tpu.memory_space<vmem>>, vector<1x4x32xf32>
    %68 = vector.shape_cast %67 : vector<1x4x32xf32> to vector<4x32xf32>
    %69 = arith.addf %66, %5 : vector<32x32xf32>
    %70 = vector.extract_strided_slice %68 {offsets = [0, 0], sizes = [1, 32], strides = [1, 1]} : vector<4x32xf32> to vector<1x32xf32>
    %71 = vector.extract_strided_slice %68 {offsets = [1, 0], sizes = [1, 32], strides = [1, 1]} : vector<4x32xf32> to vector<1x32xf32>
    %cst_32 = arith.constant dense<0.000000e+00> : vector<32xf32>
    %72 = vector.multi_reduction <add>, %69, %cst_32 [1] : vector<32x32xf32> to vector<32xf32>
    %73 = vector.shape_cast %72 : vector<32xf32> to vector<32x1xf32>
    %cst_33 = arith.constant 3.200000e+01 : f32
    %74 = vector.broadcast %cst_33 : f32 to vector<32x1xf32>
    %75 = arith.divf %73, %74 : vector<32x1xf32>
    %76 = vector.broadcast %75 : vector<32x1xf32> to vector<32x32xf32>
    %77 = arith.subf %69, %76 : vector<32x32xf32>
    %78 = arith.mulf %77, %77 : vector<32x32xf32>
    %cst_34 = arith.constant dense<0.000000e+00> : vector<32xf32>
    %79 = vector.multi_reduction <add>, %78, %cst_34 [1] : vector<32x32xf32> to vector<32xf32>
    %80 = vector.shape_cast %79 : vector<32xf32> to vector<32x1xf32>
    %cst_35 = arith.constant 3.200000e+01 : f32
    %81 = vector.broadcast %cst_35 : f32 to vector<32x1xf32>
    %82 = arith.divf %80, %81 : vector<32x1xf32>
    %83 = vector.broadcast %75 : vector<32x1xf32> to vector<32x32xf32>
    %84 = arith.subf %69, %83 : vector<32x32xf32>
    %cst_36 = arith.constant 9.99999996E-13 : f32
    %85 = vector.broadcast %cst_36 : f32 to vector<32x1xf32>
    %86 = arith.addf %82, %85 : vector<32x1xf32>
    %87 = math.rsqrt %86 : vector<32x1xf32>
    %88 = vector.broadcast %87 : vector<32x1xf32> to vector<32x32xf32>
    %89 = arith.mulf %84, %88 : vector<32x32xf32>
    %90 = vector.broadcast %70 : vector<1x32xf32> to vector<32x32xf32>
    %91 = arith.mulf %89, %90 : vector<32x32xf32>
    %92 = vector.broadcast %71 : vector<1x32xf32> to vector<32x32xf32>
    %93 = arith.addf %91, %92 : vector<32x32xf32>
    %94 = arith.truncf %93 : vector<32x32xf32> to vector<32x32xbf16>
    %c0_37 = arith.constant 0 : index
    %c0_38 = arith.constant 0 : index
    %c0_39 = arith.constant 0 : index
    %95 = vector.load %arg8[%c0_37, %c0_38, %c0_39] : memref<1x32x64xbf16, #tpu.memory_space<vmem>>, vector<1x32x64xbf16>
    %96 = vector.shape_cast %95 : vector<1x32x64xbf16> to vector<32x64xbf16>
    %cst_40 = arith.constant dense<0.000000e+00> : vector<32x64xf32>
    %97 = tpu.matmul %94, %96, %cst_40 {dimension_numbers = #tpu.dot_dimension_numbers<[1], [0], [0], [1], [0, 0, 1, 1], [], []>} : vector<32x32xbf16>, vector<32x64xbf16>, vector<32x64xf32> -> vector<32x64xf32>
    %c0_41 = arith.constant 0 : index
    %c0_42 = arith.constant 0 : index
    %c0_43 = arith.constant 0 : index
    %98 = vector.load %arg9[%c0_41, %c0_42, %c0_43] : memref<1x1x64xf32, #tpu.memory_space<vmem>>, vector<1x1x64xf32>
    %99 = vector.shape_cast %98 : vector<1x1x64xf32> to vector<1x64xf32>
    %100 = vector.broadcast %99 : vector<1x64xf32> to vector<32x64xf32>
    %101 = arith.addf %97, %100 : vector<32x64xf32>
    %cst_44 = arith.constant 5.000000e-01 : f32
    %102 = vector.broadcast %cst_44 : f32 to vector<32x64xf32>
    %103 = arith.mulf %102, %101 : vector<32x64xf32>
    %cst_45 = arith.constant 4.471500e-02 : f32
    %104 = vector.broadcast %cst_45 : f32 to vector<32x64xf32>
    %105 = arith.mulf %104, %101 : vector<32x64xf32>
    %106 = arith.mulf %105, %101 : vector<32x64xf32>
    %107 = arith.mulf %106, %101 : vector<32x64xf32>
    %108 = arith.addf %101, %107 : vector<32x64xf32>
    %cst_46 = arith.constant 0.797884583 : f32
    %109 = vector.broadcast %cst_46 : f32 to vector<32x64xf32>
    %110 = arith.mulf %109, %108 : vector<32x64xf32>
    %111 = math.tanh %110 : vector<32x64xf32>
    %cst_47 = arith.constant 1.000000e+00 : f32
    %112 = vector.broadcast %cst_47 : f32 to vector<32x64xf32>
    %113 = arith.addf %112, %111 : vector<32x64xf32>
    %114 = arith.mulf %103, %113 : vector<32x64xf32>
    %115 = arith.truncf %114 : vector<32x64xf32> to vector<32x64xbf16>
    %c0_48 = arith.constant 0 : index
    %c0_49 = arith.constant 0 : index
    %c0_50 = arith.constant 0 : index
    %116 = vector.load %arg10[%c0_48, %c0_49, %c0_50] : memref<1x64x32xbf16, #tpu.memory_space<vmem>>, vector<1x64x32xbf16>
    %117 = vector.shape_cast %116 : vector<1x64x32xbf16> to vector<64x32xbf16>
    %cst_51 = arith.constant dense<0.000000e+00> : vector<32x32xf32>
    %118 = tpu.matmul %115, %117, %cst_51 {dimension_numbers = #tpu.dot_dimension_numbers<[1], [0], [0], [1], [0, 0, 1, 1], [], []>} : vector<32x64xbf16>, vector<64x32xbf16>, vector<32x32xf32> -> vector<32x32xf32>
    %c0_52 = arith.constant 0 : index
    %c0_53 = arith.constant 0 : index
    %c0_54 = arith.constant 0 : index
    %119 = vector.load %arg11[%c0_52, %c0_53, %c0_54] : memref<1x1x32xf32, #tpu.memory_space<vmem>>, vector<1x1x32xf32>
    %120 = vector.shape_cast %119 : vector<1x1x32xf32> to vector<1x32xf32>
    %121 = vector.broadcast %120 : vector<1x32xf32> to vector<32x32xf32>
    %122 = arith.addf %118, %121 : vector<32x32xf32>
    %123 = arith.addf %122, %93 : vector<32x32xf32>
    %124 = vector.extract_strided_slice %68 {offsets = [2, 0], sizes = [1, 32], strides = [1, 1]} : vector<4x32xf32> to vector<1x32xf32>
    %125 = vector.extract_strided_slice %68 {offsets = [3, 0], sizes = [1, 32], strides = [1, 1]} : vector<4x32xf32> to vector<1x32xf32>
    %cst_55 = arith.constant dense<0.000000e+00> : vector<32xf32>
    %126 = vector.multi_reduction <add>, %123, %cst_55 [1] : vector<32x32xf32> to vector<32xf32>
    %127 = vector.shape_cast %126 : vector<32xf32> to vector<32x1xf32>
    %cst_56 = arith.constant 3.200000e+01 : f32
    %128 = vector.broadcast %cst_56 : f32 to vector<32x1xf32>
    %129 = arith.divf %127, %128 : vector<32x1xf32>
    %130 = vector.broadcast %129 : vector<32x1xf32> to vector<32x32xf32>
    %131 = arith.subf %123, %130 : vector<32x32xf32>
    %132 = arith.mulf %131, %131 : vector<32x32xf32>
    %cst_57 = arith.constant dense<0.000000e+00> : vector<32xf32>
    %133 = vector.multi_reduction <add>, %132, %cst_57 [1] : vector<32x32xf32> to vector<32xf32>
    %134 = vector.shape_cast %133 : vector<32xf32> to vector<32x1xf32>
    %cst_58 = arith.constant 3.200000e+01 : f32
    %135 = vector.broadcast %cst_58 : f32 to vector<32x1xf32>
    %136 = arith.divf %134, %135 : vector<32x1xf32>
    %137 = vector.broadcast %129 : vector<32x1xf32> to vector<32x32xf32>
    %138 = arith.subf %123, %137 : vector<32x32xf32>
    %cst_59 = arith.constant 9.99999996E-13 : f32
    %139 = vector.broadcast %cst_59 : f32 to vector<32x1xf32>
    %140 = arith.addf %136, %139 : vector<32x1xf32>
    %141 = math.rsqrt %140 : vector<32x1xf32>
    %142 = vector.broadcast %141 : vector<32x1xf32> to vector<32x32xf32>
    %143 = arith.mulf %138, %142 : vector<32x32xf32>
    %144 = vector.broadcast %124 : vector<1x32xf32> to vector<32x32xf32>
    %145 = arith.mulf %143, %144 : vector<32x32xf32>
    %146 = vector.broadcast %125 : vector<1x32xf32> to vector<32x32xf32>
    %147 = arith.addf %145, %146 : vector<32x32xf32>
    %148 = vector.shape_cast %147 : vector<32x32xf32> to vector<2x16x32xf32>
    %c0_60 = arith.constant 0 : index
    %c0_61 = arith.constant 0 : index
    %c0_62 = arith.constant 0 : index
    %149 = vector.load %arg14[%c0_60, %c0_61, %c0_62] : memref<2x16x32xf32, #tpu.memory_space<vmem>>, vector<2x16x32xf32>
    tpu.vector_store %arg14[%c0_60, %c0_61, %c0_62], %148 {strides = array<i32>} : memref<2x16x32xf32, #tpu.memory_space<vmem>>, vector<2x16x32xf32>,
    %c1_i32 = arith.constant 1 : i32
    %150 = arith.cmpi eq, %arg1, %c1_i32 : i32
    %151 = arith.extui %150 : i1 to i32
    %c0_i32_63 = arith.constant 0 : i32
    %152 = arith.cmpi ne, %151, %c0_i32_63 : i32
    scf.if %152 {
      %153 = vector.shape_cast %147 : vector<32x32xf32> to vector<2x16x32xf32>
      %154 = arith.truncf %153 : vector<2x16x32xf32> to vector<2x16x32xbf16>
      %c0_64 = arith.constant 0 : index
      %c0_65 = arith.constant 0 : index
      %c0_66 = arith.constant 0 : index
      %155 = vector.load %arg13[%c0_64, %c0_65, %c0_66] : memref<2x16x32xbf16, #tpu.memory_space<vmem>>, vector<2x16x32xbf16>
      tpu.vector_store %arg13[%c0_64, %c0_65, %c0_66], %154 {strides = array<i32>} : memref<2x16x32xbf16, #tpu.memory_space<vmem>>, vector<2x16x32xbf16>,
    } else {
    }
    return
  }
  func.func @transform_0(%arg0: i32, %arg1: i32) -> (i32, i32, i32) {
    %c0_i32 = arith.constant 0 : i32
    %c0_i32_0 = arith.constant 0 : i32
    %c0_i32_1 = arith.constant 0 : i32
    return %arg0, %c0_i32, %c0_i32_0 : i32, i32, i32
  }
  func.func @transform_1(%arg0: i32, %arg1: i32) -> (i32, i32, i32) {
    %c0_i32 = arith.constant 0 : i32
    %c0_i32_0 = arith.constant 0 : i32
    %c0_i32_1 = arith.constant 0 : i32
    return %arg0, %c0_i32, %c0_i32_0 : i32, i32, i32
  }
  func.func @transform_2(%arg0: i32, %arg1: i32) -> (i32, i32, i32) {
    %c0_i32 = arith.constant 0 : i32
    %c0_i32_0 = arith.constant 0 : i32
    %c0_i32_1 = arith.constant 0 : i32
    return %arg1, %c0_i32, %c0_i32_0 : i32, i32, i32
  }
  func.func @transform_3(%arg0: i32, %arg1: i32) -> (i32, i32, i32) {
    %c0_i32 = arith.constant 0 : i32
    %c0_i32_0 = arith.constant 0 : i32
    %c0_i32_1 = arith.constant 0 : i32
    return %arg1, %c0_i32, %c0_i32_0 : i32, i32, i32
  }
  func.func @transform_4(%arg0: i32, %arg1: i32) -> (i32, i32, i32) {
    %c0_i32 = arith.constant 0 : i32
    %c0_i32_0 = arith.constant 0 : i32
    %c0_i32_1 = arith.constant 0 : i32
    return %arg1, %c0_i32, %c0_i32_0 : i32, i32, i32
  }
  func.func @transform_5(%arg0: i32, %arg1: i32) -> (i32, i32, i32) {
    %c0_i32 = arith.constant 0 : i32
    %c0_i32_0 = arith.constant 0 : i32
    %c0_i32_1 = arith.constant 0 : i32
    return %arg1, %c0_i32, %c0_i32_0 : i32, i32, i32
  }
  func.func @transform_6(%arg0: i32, %arg1: i32) -> (i32, i32, i32) {
    %c0_i32 = arith.constant 0 : i32
    %c0_i32_0 = arith.constant 0 : i32
    %c0_i32_1 = arith.constant 0 : i32
    return %arg1, %c0_i32, %c0_i32_0 : i32, i32, i32
  }
  func.func @transform_7(%arg0: i32, %arg1: i32) -> (i32, i32, i32) {
    %c0_i32 = arith.constant 0 : i32
    %c0_i32_0 = arith.constant 0 : i32
    %c0_i32_1 = arith.constant 0 : i32
    return %arg1, %c0_i32, %c0_i32_0 : i32, i32, i32
  }
  func.func @transform_8(%arg0: i32, %arg1: i32) -> (i32, i32, i32) {
    %c0_i32 = arith.constant 0 : i32
    %c0_i32_0 = arith.constant 0 : i32
    %c0_i32_1 = arith.constant 0 : i32
    return %arg1, %c0_i32, %c0_i32_0 : i32, i32, i32
  }
  func.func @transform_9(%arg0: i32, %arg1: i32) -> (i32, i32, i32) {
    %c0_i32 = arith.constant 0 : i32
    %c0_i32_0 = arith.constant 0 : i32
    %c0_i32_1 = arith.constant 0 : i32
    return %arg1, %c0_i32, %c0_i32_0 : i32, i32, i32
  }
  func.func @transform_10(%arg0: i32, %arg1: i32) -> (i32, i32, i32) {
    %c0_i32 = arith.constant 0 : i32
    %c0_i32_0 = arith.constant 0 : i32
    %c0_i32_1 = arith.constant 0 : i32
    return %arg1, %c0_i32, %c0_i32_0 : i32, i32, i32
  }
  func.func @transform_11(%arg0: i32, %arg1: i32) -> (i32, i32, i32) {
    %c0_i32 = arith.constant 0 : i32
    %c0_i32_0 = arith.constant 0 : i32
    %c0_i32_1 = arith.constant 0 : i32
    return %arg0, %c0_i32, %c0_i32_0 : i32, i32, i32
  }
}

</mosaic_0001>

<bundles_post_ra>
// kernel: tpu_custom_call.1
= control target key start
LH: loop header
LB: loop body
LE: loop exit
PB: predicated region body
PF: predicated region fallthrough
CT: control target
= control target key end

     0   :  { %s3652_s0 = inlined_call_operand.hbm [shape: bf16[2,16,32], index: 0, kind: input, shape index: {}]   ;;  %s3653_s1 = inlined_call_operand.hbm [shape: f32[2,1,16], index: 1, kind: input, shape index: {}]   ;;  %s3654_s2 = inlined_call_operand.hbm [shape: bf16[2,32,96], index: 2, kind: input, shape index: {}]   ;;  %s3655_s3 = inlined_call_operand.hbm [shape: f32[2,1,96], index: 3, kind: input, shape index: {}]   ;;  %s3656_s4 = inlined_call_operand.hbm [shape: bf16[2,32,32], index: 4, kind: input, shape index: {}]   ;;  %s3657_s5 = inlined_call_operand.hbm [shape: f32[2,1,32], index: 5, kind: input, shape index: {}]   ;;  %s3658_s6 = inlined_call_operand.hbm [shape: bf16[2,32,64], index: 6, kind: input, shape index: {}]   ;;  %s3659_s7 = inlined_call_operand.hbm [shape: f32[2,1,64], index: 7, kind: input, shape index: {}]   ;;  %s3660_s8 = inlined_call_operand.hbm [shape: bf16[2,64,32], index: 8, kind: input, shape index: {}]   ;;  %s3661_s9 = inlined_call_operand.hbm [shape: f32[2,1,32], index: 9, kind: input, shape index: {}]   ;;  %s3662_s10 = inlined_call_operand.hbm [shape: f32[2,4,32], index: 10, kind: input, shape index: {}]   ;;  %s3663_s11 = inlined_call_operand.hbm [shape: bf16[2,16,32], index: 11, kind: output, shape index: {}]  }
   0x1   :  { %3693 = sst [smem:[#allocation31_spill]] %s3652_s0 }
   0x2   :  { %3694 = sst [smem:[#allocation32_spill]] %s3654_s2 }
   0x3   :  { %3695 = sst [smem:[#allocation33_spill]] %s3655_s3 }
   0x4   :  { %3696 = sst [smem:[#allocation34_spill]] %s3656_s4 }
   0x5   :  { %3697 = sst [smem:[#allocation35_spill]] %s3662_s10 }
   0x6   :  { %3698 = sst [smem:[#allocation36_spill]] %s3663_s11 }
   0x7   :  { %16 = vsyncpa [#allocation4], 0 }
   0x8   :  { %17 = vsyncpa [#allocation7], 0 }
   0x9   :  { %18 = vsyncpa [#allocation5], 0  ;;  %s2980_s17 = smov 0   ;;  %s2982_s18 = smov 0  }
   0xa   :  { %s2984_s19 = smov 0   ;;  %s2986_s20 = smov 0  }
   0xb   :  { %s2988_s21 = smov 0   ;;  %s2990_s22 = smov 0  }
   0xc LB: > { %3699 = sst [smem:[#allocation22_spill]] %s2877_s18  ;;  %s3009_s23 = sadd.s32 4294967295, %s2893_s22   ;;  %s2893_s22 = sphi %s2990_s22, %s24_s22   ;;  %s2889_s21 = sphi %s2988_s21, %s3750_s21   ;;  %s2885_s20 = sphi %s2986_s20, %s3749_s20   ;;  %s2881_s19 = sphi %s2984_s19, %s3747_s19   ;;  %s2877_s18 = sphi %s2982_s18, %s3746_s18   ;;  %s2873_s17 = sphi %s2980_s17, %s3745_s17  }
   0xd   : > { %3700 = sst [smem:[#allocation23_spill]] %s2881_s19  ;;  %p102_p0 = scmp.ne.s32.totalorder %s2881_s19, %s2877_s18 }
   0xe   : > { %3701 = sst [smem:[#allocation24_spill]] %s2885_s20  ;;  %p103_p1 = scmp.eq.s32.totalorder %s2893_s22, 0 }
   0xf   : > { %3702 = sst [smem:[#allocation25_spill]] %s2893_s22  ;;  %p108_p2 = scmp.ne.s32.totalorder %s2877_s18, %s2873_s17 }
  0x10   : > { %3703 = sst [smem:[#allocation26_spill]] %s3009_s23  ;;  %p3665_p3 = scmp.eq.s32.totalorder %s3009_s23, 0 }
  0x11   : > { %p104_p4 = por %p103_p1, %p102_p0  ;;  %p2070_p5 = scmp.ge.s32.totalorder %s2893_s22, 1 }
  0x12   : > { %p3020_p6 = por %p3665_p3, %p108_p2  ;;  %p353_p7 = scmp.lt.s32.totalorder %s2893_s22, 3 }
  0x13   : > { %s2895_s27 = smov [#allocation3]   ;;  %p2344_p10 = scmp.lt.s32.totalorder %s2893_s22, 2 }
  0x14   : > { %s3704_s25 = scalar_select %p3020_p6, 1, 0 }
  0x15   : > { %p3025_p8 = pnand %p2070_p5, %p353_p7  ;;  %s369_s28 = sshll.u32 %s2895_s27, 4  ;;  %s370_s28 = int_to_ptr.vmem [resolvable:$true] %s369_s28 }
  0x16   : > { %3705 = sst [smem:[#allocation27_spill]] %s3704_s25  ;;  %s3039_s30 = sand.u32 1, %s2881_s19  }
  0x17   : > { %s3706_s26 = scalar_select %p3025_p8, 1, 0 }
  0x18   : > { %p2307_p9 = pneg %p3025_p8  ;;  %p3041_p12 = pnand %p2344_p10, %p104_p4 }
  0x19   : > { %3707 = sst [smem:[#allocation28_spill]] %s3706_s26  ;;  %s3710_s0 = sld [smem:[#allocation31_spill]] }
  0x1a   : > { %p3034_p11 = pnand %p2307_p9, %p3665_p3 }
  0x1b   : > { %s3709_s12 = scalar_select %p3041_p12, 1, 0 }
  0x1c   : > { %s3708_s29 = scalar_select %p3034_p11, 1, 0 }
  0x1d   : > { %p3680_p0 = pneg %p3034_p11 }
  0x1f   : > { %s2479_s15 = scalar_lea.hbm %s3710_s0, 256 }
  0x20   : > { %p2480_p13 = scmp.ne.s32.totalorder %s3710_s0, %s2479_s15  ;;  %p2486_p4 = scmp.lt.u32.totalorder %s2479_s15, %s3710_s0 }
  0x22   : > { %p2482_p1 = pnand %p3680_p0, %p2480_p13 }
  0x24   : > { %p2483_p2 = pneg %p2482_p1 }
  0x26   : > { %p2488_p5 = pnand %p2486_p4, %p2483_p2 }
  0x28   : > { %2491 = shalt.err (!%p2488_p5)
}
  0x29   : > { %s2492_s11 = scalar_lea.vmem %s370_s28, 256  ;;  %p2500_p3 = scmp.lt.s32.totalorder %s370_s28, %s370_s28 }
  0x2a   : > { %p2493_p7 = scmp.ne.s32.totalorder %s370_s28, %s2492_s11  ;;  %p2501_p6 = scmp.lt.s32.totalorder %s2492_s11, %s2492_s11 }
  0x2c   : > { %p2495_p9 = pnand %p2493_p7, %p3680_p0  ;;  %p2502_p8 = por %p2501_p6, %p2500_p3 }
  0x2e   : > { %p2496_p10 = pneg %p2495_p9 }
  0x30   : > { %p2503_p12 = pnand %p2502_p8, %p2496_p10 }
  0x32   : > { %2506 = shalt.err (!%p2503_p12)
}
  0x33   : > { %s3675_s13 = smov 64   ;;  %s3677_s24 = smov 4  }
  0x34   : > { %2310 = dma.hbm_to_vmem [thread:$0]  (!%p3034_p11), %s3710_s0, 256, %s370_s28, [#allocation4], %s3675_s13, %s3675_s13, %s3677_s24  }
  0x35   : > { %s33_s11 = sadd.s32 1, %s2889_s21  ;;  %s399_s16 = sand.u32 1, %s2893_s22  }
  0x36   : > { %p34_p3 = scmp.ge.s32.totalorder %s33_s11, 2  ;;  %s3073_s17 = sshll.u32 %s3039_s30, 4 }
  0x37   : > { %s3078_s27 = sshll.u32 %s2889_s21, 8  ;;  %s3712_s2 = sld [smem:[#allocation32_spill]] }
  0x38   : > { %s3752_s11 = smov (%p34_p3, %s33_s11), 0  ;;  %s403_s28 = scalar_lea.vmem [#allocation8], %s3073_s17 }
  0x39   : > { %3711 = sst [smem:[#allocation29_spill]] %s3752_s11  ;;  %s92_s20 = ssub.s32 %s2889_s21, %s3752_s11 }
  0x3a   : > { %p93_p6 = scmp.eq.s32.totalorder %s92_s20, 0  ;;  %s410_s14 = sshll.u32 %s403_s28, 4  ;;  %s3089_s14 = int_to_ptr.vmem [resolvable:$true] %s410_s14 }
  0x3b   : > { %s3713_s15 = sadd.s32 1, %s2881_s19  ;;  %s3096_s24 = scalar_lea.sflag [#allocation4], %s399_s16 }
  0x3c   : > { %s3094_s13 = scalar_select %p93_p6, %s2881_s19, %s3713_s15  }
  0x3d   : > { %s3086_s23 = scalar_lea.hbm %s3712_s2, %s3078_s27  ;;  %p3715_p12 = scmp.ne.s32.totalorder %s3709_s12, 0 }
  0x3e   : > { %3714 = sst [smem:[#allocation30_spill]] %s3094_s13  ;;  %s2507_s0 = scalar_lea.hbm %s3086_s23, 256 }
  0x3f   : > { %p2508_p8 = scmp.ne.s32.totalorder %s3086_s23, %s2507_s0  ;;  %p3102_p13 = pneg %p3715_p12 }
  0x40   : > { %s2512_s28 = scalar_lea.hbm %s3712_s2, 512  ;;  %p2513_p4 = scmp.lt.u32.totalorder %s3086_s23, %s3712_s2 }
  0x41   : > { %s3716_s18 = scalar_select %p3102_p13, 1, 0 }
  0x42   : > { %p2510_p1 = pnand %p3102_p13, %p2508_p8  ;;  %p2514_p5 = scmp.lt.u32.totalorder %s2512_s28, %s2507_s0 }
  0x43   : > { %p2516_p9 = scmp.lt.u32.totalorder %s2507_s0, %s3086_s23 }
  0x44   : > { %p2511_p2 = pneg %p2510_p1  ;;  %p2515_p7 = por %p2514_p5, %p2513_p4 }
  0x46   : > { %p2517_p10 = por %p2516_p9, %p2515_p7 }
  0x48   : > { %p2518_p3 = pnand %p2517_p10, %p2511_p2 }
  0x4a   : > { %2521 = shalt.err (!%p2518_p3)
}
  0x4b   : > { %s2522_s16 = scalar_lea.vmem %s3089_s14, 256  ;;  %s2898_s20 = smov [#allocation8]  }
  0x4c   : > { %p2523_p6 = scmp.ne.s32.totalorder %s3089_s14, %s2522_s16  ;;  %s2527_s25 = sshll.u32 %s2898_s20, 4  ;;  %s2528_s25 = int_to_ptr.vmem [resolvable:$false] %s2527_s25 }
  0x4d   : > { %s2529_s11 = scalar_lea.vmem %s2528_s25, 512  ;;  %p2530_p0 = scmp.lt.s32.totalorder %s3089_s14, %s2528_s25 }
  0x4e   : > { %p2525_p8 = pnand %p2523_p6, %p3102_p13  ;;  %p2531_p11 = scmp.lt.s32.totalorder %s2529_s11, %s2522_s16 }
  0x50   : > { %p2526_p1 = pneg %p2525_p8  ;;  %p2532_p4 = por %p2531_p11, %p2530_p0 }
  0x52   : > { %p2533_p5 = pnand %p2532_p4, %p2526_p1 }
  0x54   : > { %2536 = shalt.err (!%p2533_p5)
}
  0x55   : > { %s3717_s0 = smov 4   ;;  %s3718_s28 = smov 64  }
  0x56   : > { %2317 = dma.hbm_to_vmem [thread:$0]  (!%p3715_p12), %s3086_s23, 256, %s3089_s14, %s3096_s24, %s3718_s28, %s3718_s28, %s3717_s0  }
  0x57   : > { %s3130_s15 = sshll.u32 %s2889_s21, 4  ;;  %s423_s20 = scalar_lea.vmem [#allocation9], %s3039_s30 }
  0x58   : > { %s430_s16 = sshll.u32 %s423_s20, 4  ;;  %s3719_s3 = sld [smem:[#allocation33_spill]]  ;;  %s431_s16 = int_to_ptr.vmem [resolvable:$true] %s430_s16 }
  0x5e   : > { %s428_s2 = scalar_lea.hbm %s3719_s3, %s3130_s15  ;;  %s2542_s26 = scalar_lea.hbm %s3719_s3, 32 }
  0x5f   : > { %s2537_s13 = scalar_lea.hbm %s428_s2, 16  ;;  %p2543_p7 = scmp.lt.u32.totalorder %s428_s2, %s3719_s3 }
  0x60   : > { %p2538_p11 = scmp.ne.s32.totalorder %s428_s2, %s2537_s13  ;;  %p2544_p9 = scmp.lt.u32.totalorder %s2542_s26, %s2537_s13 }
  0x61   : > { %p2546_p3 = scmp.lt.u32.totalorder %s2537_s13, %s428_s2 }
  0x62   : > { %p2540_p0 = pnand %p2538_p11, %p3102_p13  ;;  %p2545_p10 = por %p2544_p9, %p2543_p7 }
  0x64   : > { %p2541_p2 = pneg %p2540_p0  ;;  %p2547_p6 = por %p2546_p3, %p2545_p10 }
  0x66   : > { %p2548_p8 = pnand %p2547_p6, %p2541_p2 }
  0x68   : > { %2551 = shalt.err (!%p2548_p8)
}
  0x69   : > { %s2552_s20 = scalar_lea.vmem %s431_s16, 16  ;;  %s2899_s25 = smov [#allocation9]  }
  0x6a   : > { %p2553_p1 = scmp.ne.s32.totalorder %s431_s16, %s2552_s20  ;;  %s2557_s11 = sshll.u32 %s2899_s25, 4  ;;  %s2558_s11 = int_to_ptr.vmem [resolvable:$false] %s2557_s11 }
  0x6b   : > { %s2559_s19 = scalar_lea.vmem %s2558_s11, 32  ;;  %p2560_p11 = scmp.lt.s32.totalorder %s431_s16, %s2558_s11 }
  0x6c   : > { %p2555_p4 = pnand %p2553_p1, %p3102_p13  ;;  %p2561_p0 = scmp.lt.s32.totalorder %s2559_s19, %s2552_s20 }
  0x6e   : > { %p2556_p5 = pneg %p2555_p4  ;;  %p2562_p12 = por %p2561_p0, %p2560_p11 }
  0x70   : > { %p2563_p7 = pnand %p2562_p12, %p2556_p5 }
  0x72   : > { %2566 = shalt.err (!%p2563_p7)
}
  0x73   : > { %p3720_p9 = scmp.ne.s32.totalorder %s3709_s12, 0  ;;  %s3721_s4 = sld [smem:[#allocation34_spill]] }
  0x74   : > { %s441_s23 = scalar_lea.vmem [#allocation10], %s3073_s17  ;;  %s3163_s11 = scalar_lea.hbm %s3657_s5, %s3130_s15 }
  0x75   : > { %2320 = dma.hbm_to_vmem [thread:$0]  (!%p3720_p9), %s428_s2, 16, %s431_s16, %s3096_s24  }
  0x76   : > { %s448_s14 = sshll.u32 %s441_s23, 4  ;;  %s3157_s14 = int_to_ptr.vmem [resolvable:$true] %s448_s14 }
  0x79   : > { %s3154_s13 = scalar_lea.hbm %s3721_s4, %s3078_s27  ;;  %s2572_s22 = scalar_lea.hbm %s3721_s4, 512 }
  0x7a   : > { %s2567_s19 = scalar_lea.hbm %s3154_s13, 256  ;;  %p2573_p3 = scmp.lt.u32.totalorder %s3154_s13, %s3721_s4 }
  0x7b   : > { %p2568_p12 = scmp.ne.s32.totalorder %s3154_s13, %s2567_s19  ;;  %p2574_p6 = scmp.lt.u32.totalorder %s2572_s22, %s2567_s19 }
  0x7c   : > { %p2576_p1 = scmp.lt.u32.totalorder %s2567_s19, %s3154_s13 }
  0x7d   : > { %p2570_p2 = pnand %p2568_p12, %p3102_p13  ;;  %p2575_p8 = por %p2574_p6, %p2573_p3 }
  0x7f   : > { %p2571_p10 = pneg %p2570_p2  ;;  %p2577_p4 = por %p2576_p1, %p2575_p8 }
  0x81   : > { %p2578_p5 = pnand %p2577_p4, %p2571_p10 }
  0x83   : > { %2581 = shalt.err (!%p2578_p5)
}
  0x84   : > { %s2582_s23 = scalar_lea.vmem %s3157_s14, 256  ;;  %s2900_s20 = smov [#allocation10]  }
  0x85   : > { %p2583_p11 = scmp.ne.s32.totalorder %s3157_s14, %s2582_s23  ;;  %s2587_s25 = sshll.u32 %s2900_s20, 4  ;;  %s2588_s25 = int_to_ptr.vmem [resolvable:$false] %s2587_s25 }
  0x86   : > { %s2589_s3 = scalar_lea.vmem %s2588_s25, 512  ;;  %p2590_p12 = scmp.lt.s32.totalorder %s3157_s14, %s2588_s25 }
  0x87   : > { %p2585_p0 = pnand %p2583_p11, %p3102_p13  ;;  %p2591_p2 = scmp.lt.s32.totalorder %s2589_s3, %s2582_s23 }
  0x89   : > { %p2586_p7 = pneg %p2585_p0  ;;  %p2592_p3 = por %p2591_p2, %p2590_p12 }
  0x8b   : > { %p2593_p6 = pnand %p2592_p3, %p2586_p7 }
  0x8d   : > { %2596 = shalt.err (!%p2593_p6)
}
  0x8e   : > { %2323 = dma.hbm_to_vmem [thread:$0]  (!%p3720_p9), %s3154_s13, 256, %s3157_s14, %s3096_s24, %s3718_s28, %s3718_s28, %s3717_s0  }
  0x8f   : > { %s461_s19 = scalar_lea.vmem [#allocation11], %s3039_s30  ;;  %s3195_s26 = scalar_lea.hbm %s3658_s6, %s3078_s27 }
  0x90   : > { %s468_s2 = sshll.u32 %s461_s19, 4  ;;  %s2597_s23 = scalar_lea.hbm %s3163_s11, 16  ;;  %s469_s2 = int_to_ptr.vmem [resolvable:$true] %s468_s2 }
  0x91   : > { %p2598_p10 = scmp.ne.s32.totalorder %s3163_s11, %s2597_s23  ;;  %s2602_s3 = scalar_lea.hbm %s3657_s5, 32 }
  0x92   : > { %p2603_p4 = scmp.lt.u32.totalorder %s3163_s11, %s3657_s5  ;;  %p2604_p5 = scmp.lt.u32.totalorder %s2602_s3, %s2597_s23 }
  0x93   : > { %p2600_p8 = pnand %p2598_p10, %p3102_p13  ;;  %p2606_p0 = scmp.lt.u32.totalorder %s2597_s23, %s3163_s11 }
  0x94   : > { %p2605_p11 = por %p2604_p5, %p2603_p4 }
  0x95   : > { %p2601_p1 = pneg %p2600_p8 }
  0x96   : > { %p2607_p7 = por %p2606_p0, %p2605_p11 }
  0x98   : > { %p2608_p12 = pnand %p2607_p7, %p2601_p1 }
  0x9a   : > { %2611 = shalt.err (!%p2608_p12)
}
  0x9b   : > { %s2612_s27 = scalar_lea.vmem %s469_s2, 16  ;;  %s2901_s13 = smov [#allocation11]  }
  0x9c   : > { %p2613_p2 = scmp.ne.s32.totalorder %s469_s2, %s2612_s27  ;;  %s2617_s14 = sshll.u32 %s2901_s13, 4  ;;  %s2618_s14 = int_to_ptr.vmem [resolvable:$false] %s2617_s14 }
  0x9d   : > { %s2619_s19 = scalar_lea.vmem %s2618_s14, 32  ;;  %p2620_p10 = scmp.lt.s32.totalorder %s469_s2, %s2618_s14 }
  0x9e   : > { %p2615_p3 = pnand %p2613_p2, %p3102_p13  ;;  %p2621_p8 = scmp.lt.s32.totalorder %s2619_s19, %s2612_s27 }
  0xa0   : > { %p2616_p6 = pneg %p2615_p3  ;;  %p2622_p9 = por %p2621_p8, %p2620_p10 }
  0xa2   : > { %p2623_p4 = pnand %p2622_p9, %p2616_p6 }
  0xa4   : > { %2626 = shalt.err (!%p2623_p4)
}
  0xa5   : > { %p3722_p5 = scmp.ne.s32.totalorder %s3709_s12, 0  ;;  %s479_s4 = scalar_lea.vmem [#allocation12], %s3073_s17 }
  0xa6   : > { %s486_s10 = sshll.u32 %s479_s4, 4  ;;  %s3222_s23 = scalar_lea.hbm %s3659_s7, %s3130_s15  ;;  %s3216_s10 = int_to_ptr.vmem [resolvable:$true] %s486_s10 }
  0xa7   : > { %2326 = dma.hbm_to_vmem [thread:$0]  (!%p3722_p5), %s3163_s11, 16, %s469_s2, %s3096_s24  }
  0xa8   : > { %s2627_s20 = scalar_lea.hbm %s3195_s26, 256  ;;  %s2632_s27 = scalar_lea.hbm %s3658_s6, 512 }
  0xa9   : > { %p2628_p9 = scmp.ne.s32.totalorder %s3195_s26, %s2627_s20  ;;  %p2633_p0 = scmp.lt.u32.totalorder %s3195_s26, %s3658_s6 }
  0xaa   : > { %p2634_p7 = scmp.lt.u32.totalorder %s2632_s27, %s2627_s20  ;;  %p2636_p2 = scmp.lt.u32.totalorder %s2627_s20, %s3195_s26 }
  0xab   : > { %p2630_p1 = pnand %p2628_p9, %p3102_p13 }
  0xac   : > { %p2635_p12 = por %p2634_p7, %p2633_p0 }
  0xad   : > { %p2631_p11 = pneg %p2630_p1 }
  0xae   : > { %p2637_p3 = por %p2636_p2, %p2635_p12 }
  0xb0   : > { %p2638_p6 = pnand %p2637_p3, %p2631_p11 }
  0xb2   : > { %2641 = shalt.err (!%p2638_p6)
}
  0xb3   : > { %s2642_s17 = scalar_lea.vmem %s3216_s10, 256  ;;  %s2902_s2 = smov [#allocation12]  }
  0xb4   : > { %p2643_p10 = scmp.ne.s32.totalorder %s3216_s10, %s2642_s17  ;;  %s2647_s14 = sshll.u32 %s2902_s2, 4  ;;  %s2648_s14 = int_to_ptr.vmem [resolvable:$false] %s2647_s14 }
  0xb5   : > { %s2649_s19 = scalar_lea.vmem %s2648_s14, 512  ;;  %p2650_p9 = scmp.lt.s32.totalorder %s3216_s10, %s2648_s14 }
  0xb6   : > { %p2645_p8 = pnand %p2643_p10, %p3102_p13  ;;  %p2651_p1 = scmp.lt.s32.totalorder %s2649_s19, %s2642_s17 }
  0xb8   : > { %p2646_p4 = pneg %p2645_p8  ;;  %p2652_p0 = por %p2651_p1, %p2650_p9 }
  0xba   : > { %p2653_p7 = pnand %p2652_p0, %p2646_p4 }
  0xbc   : > { %2656 = shalt.err (!%p2653_p7)
}
  0xbd   : > { %2329 = dma.hbm_to_vmem [thread:$0]  (!%p3722_p5), %s3195_s26, 256, %s3216_s10, %s3096_s24, %s3718_s28, %s3718_s28, %s3717_s0  }
  0xbe   : > { %s499_s4 = scalar_lea.vmem [#allocation13], %s3039_s30  ;;  %s2086_s22 = sshll.u32 %s3039_s30, 5 }
  0xbf   : > { %s506_s16 = sshll.u32 %s499_s4, 4  ;;  %s2657_s20 = scalar_lea.hbm %s3222_s23, 16  ;;  %s507_s16 = int_to_ptr.vmem [resolvable:$true] %s506_s16 }
  0xc0   : > { %p2658_p11 = scmp.ne.s32.totalorder %s3222_s23, %s2657_s20  ;;  %s2662_s27 = scalar_lea.hbm %s3659_s7, 32 }
  0xc1   : > { %p2663_p3 = scmp.lt.u32.totalorder %s3222_s23, %s3659_s7  ;;  %p2664_p6 = scmp.lt.u32.totalorder %s2662_s27, %s2657_s20 }
  0xc2   : > { %p2660_p12 = pnand %p2658_p11, %p3102_p13  ;;  %p2666_p8 = scmp.lt.u32.totalorder %s2657_s20, %s3222_s23 }
  0xc3   : > { %p2665_p10 = por %p2664_p6, %p2663_p3 }
  0xc4   : > { %p2661_p2 = pneg %p2660_p12 }
  0xc5   : > { %p2667_p4 = por %p2666_p8, %p2665_p10 }
  0xc7   : > { %p2668_p9 = pnand %p2667_p4, %p2661_p2 }
  0xc9   : > { %2671 = shalt.err (!%p2668_p9)
}
  0xca   : > { %s2672_s26 = scalar_lea.vmem %s507_s16, 16  ;;  %s2903_s10 = smov [#allocation13]  }
  0xcb   : > { %p2673_p1 = scmp.ne.s32.totalorder %s507_s16, %s2672_s26  ;;  %s2677_s17 = sshll.u32 %s2903_s10, 4  ;;  %s2678_s17 = int_to_ptr.vmem [resolvable:$false] %s2677_s17 }
  0xcc   : > { %s2679_s2 = scalar_lea.vmem %s2678_s17, 32  ;;  %p2680_p11 = scmp.lt.s32.totalorder %s507_s16, %s2678_s17 }
  0xcd   : > { %p2675_p0 = pnand %p2673_p1, %p3102_p13  ;;  %p2681_p12 = scmp.lt.s32.totalorder %s2679_s2, %s2672_s26 }
  0xcf   : > { %p2676_p7 = pneg %p2675_p0  ;;  %p2682_p5 = por %p2681_p12, %p2680_p11 }
  0xd1   : > { %p2683_p3 = pnand %p2682_p5, %p2676_p7 }
  0xd3   : > { %2686 = shalt.err (!%p2683_p3)
}
  0xd4   : > { %p3723_p6 = scmp.ne.s32.totalorder %s3709_s12, 0  ;;  %s2145_s14 = sshll.u32 %s2889_s21, 9 }
  0xd5   : > { %s517_s19 = scalar_lea.vmem [#allocation14], %s2086_s22  ;;  %s3275_s3 = scalar_lea.hbm %s3660_s8, %s2145_s14 }
  0xd6   : > { %2332 = dma.hbm_to_vmem [thread:$0]  (!%p3723_p6), %s3222_s23, 16, %s507_s16, %s3096_s24  }
  0xd7   : > { %s524_s4 = sshll.u32 %s517_s19, 4  ;;  %s2687_s27 = scalar_lea.hbm %s3275_s3, 512  ;;  %s3277_s4 = int_to_ptr.vmem [resolvable:$true] %s524_s4 }
  0xd8   : > { %p2688_p5 = scmp.ne.s32.totalorder %s3275_s3, %s2687_s27  ;;  %s2692_s22 = scalar_lea.hbm %s3660_s8, 1024 }
  0xd9   : > { %p2693_p8 = scmp.lt.u32.totalorder %s3275_s3, %s3660_s8  ;;  %p2694_p4 = scmp.lt.u32.totalorder %s2692_s22, %s2687_s27 }
  0xda   : > { %p2690_p2 = pnand %p2688_p5, %p3102_p13  ;;  %p2696_p1 = scmp.lt.u32.totalorder %s2687_s27, %s3275_s3 }
  0xdb   : > { %p2695_p9 = por %p2694_p4, %p2693_p8 }
  0xdc   : > { %p2691_p10 = pneg %p2690_p2 }
  0xdd   : > { %p2697_p0 = por %p2696_p1, %p2695_p9 }
  0xdf   : > { %p2698_p7 = pnand %p2697_p0, %p2691_p10 }
  0xe1   : > { %2701 = shalt.err (!%p2698_p7)
}
  0xe2   : > { %s2702_s26 = scalar_lea.vmem %s3277_s4, 512  ;;  %s2904_s10 = smov [#allocation14]  }
  0xe3   : > { %p2703_p11 = scmp.ne.s32.totalorder %s3277_s4, %s2702_s26  ;;  %s2707_s17 = sshll.u32 %s2904_s10, 4  ;;  %s2708_s17 = int_to_ptr.vmem [resolvable:$false] %s2707_s17 }
  0xe4   : > { %s2709_s2 = scalar_lea.vmem %s2708_s17, 1024  ;;  %p2710_p5 = scmp.lt.s32.totalorder %s3277_s4, %s2708_s17 }
  0xe5   : > { %p2705_p12 = pnand %p2703_p11, %p3102_p13  ;;  %p2711_p2 = scmp.lt.s32.totalorder %s2709_s2, %s2702_s26 }
  0xe7   : > { %p2706_p3 = pneg %p2705_p12  ;;  %p2712_p8 = por %p2711_p2, %p2710_p5 }
  0xe9   : > { %p2713_p4 = pnand %p2712_p8, %p2706_p3 }
  0xeb   : > { %2716 = shalt.err (!%p2713_p4)
}
  0xec   : > { %2335 = dma.hbm_to_vmem [thread:$0]  (!%p3723_p6), %s3275_s3, 512, %s3277_s4, %s3096_s24, %s3718_s28, %s3718_s28, %s3717_s0  }
  0xed   : > { %s3308_s20 = scalar_lea.hbm %s3661_s9, %s3130_s15  ;;  %s537_s25 = scalar_lea.vmem [#allocation15], %s3039_s30 }
  0xee   : > { %s544_s27 = sshll.u32 %s537_s25, 4  ;;  %s2905_s23 = smov [#allocation6]   ;;  %s3311_s27 = int_to_ptr.vmem [resolvable:$true] %s544_s27 }
  0xef   : > { %s385_s16 = sshll.u32 %s2905_s23, 4  ;;  %s2717_s22 = scalar_lea.hbm %s3308_s20, 16  ;;  %s386_s16 = int_to_ptr.vmem [resolvable:$true] %s385_s16 }
  0xf0   : > { %p2718_p10 = scmp.ne.s32.totalorder %s3308_s20, %s2717_s22  ;;  %s2722_s15 = scalar_lea.hbm %s3661_s9, 32 }
  0xf1   : > { %p2723_p0 = scmp.lt.u32.totalorder %s3308_s20, %s3661_s9  ;;  %p2724_p7 = scmp.lt.u32.totalorder %s2722_s15, %s2717_s22 }
  0xf2   : > { %p2720_p9 = pnand %p2718_p10, %p3102_p13  ;;  %p2726_p12 = scmp.lt.u32.totalorder %s2717_s22, %s3308_s20 }
  0xf3   : > { %p2725_p11 = por %p2724_p7, %p2723_p0 }
  0xf4   : > { %p2721_p1 = pneg %p2720_p9 }
  0xf5   : > { %p2727_p3 = por %p2726_p12, %p2725_p11 }
  0xf7   : > { %p2728_p5 = pnand %p2727_p3, %p2721_p1 }
  0xf9   : > { %2731 = shalt.err (!%p2728_p5)
}
  0xfa   : > { %s2732_s13 = scalar_lea.vmem %s3311_s27, 16  ;;  %s2906_s11 = smov [#allocation15]  }
  0xfb   : > { %p2733_p2 = scmp.ne.s32.totalorder %s3311_s27, %s2732_s13  ;;  %s2737_s26 = sshll.u32 %s2906_s11, 4  ;;  %s2738_s26 = int_to_ptr.vmem [resolvable:$false] %s2737_s26 }
  0xfc   : > { %s2739_s10 = scalar_lea.vmem %s2738_s26, 32  ;;  %p2740_p10 = scmp.lt.s32.totalorder %s3311_s27, %s2738_s26 }
  0xfd   : > { %p2735_p8 = pnand %p2733_p2, %p3102_p13  ;;  %p2741_p9 = scmp.lt.s32.totalorder %s2739_s10, %s2732_s13 }
  0xff   : > { %p2736_p4 = pneg %p2735_p8  ;;  %p2742_p0 = por %p2741_p9, %p2740_p10 }
 0x101   : > { %p2743_p7 = pnand %p2742_p0, %p2736_p4 }
 0x103   : > { %2746 = shalt.err (!%p2743_p7)
}
 0x104   : > { %2338 = dma.hbm_to_vmem [thread:$0]  (!%p3723_p6), %s3308_s20, 16, %s3311_s27, %s3096_s24  }
 0x105   : > { %s2090_s17 = sshll.u32 %s3039_s30, 2  ;;  %s2747_s19 = scalar_lea.hbm %s3653_s1, 32 }
 0x106   : > { %p2748_p1 = scmp.ne.s32.totalorder %s3653_s1, %s2747_s19  ;;  %p3724_p11 = scmp.ne.s32.totalorder %s3708_s29, 0 }
 0x107   : > { %p2754_p2 = scmp.lt.u32.totalorder %s2747_s19, %s3653_s1 }
 0x108   : > { %p3725_p12 = pneg %p3724_p11 }
 0x10a   : > { %p2750_p3 = pnand %p2748_p1, %p3725_p12 }
 0x10c   : > { %p2751_p5 = pneg %p2750_p3 }
 0x10e   : > { %p2756_p8 = pnand %p2754_p2, %p2751_p5 }
 0x110   : > { %2759 = shalt.err (!%p2756_p8)
}
 0x111   : > { %s2760_s20 = scalar_lea.vmem %s386_s16, 32  ;;  %p3726_p10 = pmov %p3725_p12 }
 0x112   : > { %p2761_p4 = scmp.ne.s32.totalorder %s386_s16, %s2760_s20  ;;  %p2768_p7 = scmp.lt.s32.totalorder %s386_s16, %s386_s16 }
 0x113   : > { %p2769_p6 = scmp.lt.s32.totalorder %s2760_s20, %s2760_s20 }
 0x114   : > { %p2763_p9 = pnand %p2761_p4, %p3726_p10 }
 0x115   : > { %p2770_p13 = por %p2769_p6, %p2768_p7 }
 0x116   : > { %p2764_p0 = pneg %p2763_p9 }
 0x118   : > { %p2771_p1 = pnand %p2770_p13, %p2764_p0 }
 0x11a   : > { %2774 = shalt.err (!%p2771_p1)
}
 0x11b   : > { %s2907_s30 = smov 16   ;;  %s2908_s27 = smov 1  }
 0x11c   : > { %2313 = dma.hbm_to_vmem [thread:$0]  (!%p3724_p11), %s3653_s1, 32, %s386_s16, [#allocation7], %s2907_s30, %s2907_s30, %s2908_s27  }
 0x11d   : > { %s2091_s4 = sshll.u32 %s2889_s21, 6  ;;  %s3727_s11 = sld [smem:[#allocation35_spill]] }
 0x11e   : > { %s555_s10 = scalar_lea.vmem [#allocation16], %s2090_s17  ;;  %p3728_p6 = scmp.ne.s32.totalorder %s3716_s18, 0 }
 0x11f   : > { %s562_s2 = sshll.u32 %s555_s10, 4  ;;  %s563_s2 = int_to_ptr.vmem [resolvable:$true] %s562_s2 }
 0x123   : > { %s3360_s26 = scalar_lea.hbm %s3727_s11, %s2091_s4  ;;  %s2780_s19 = scalar_lea.hbm %s3727_s11, 128 }
 0x124   : > { %s2775_s14 = scalar_lea.hbm %s3360_s26, 64  ;;  %p2781_p11 = scmp.lt.u32.totalorder %s3360_s26, %s3727_s11 }
 0x125   : > { %p2776_p13 = scmp.ne.s32.totalorder %s3360_s26, %s2775_s14  ;;  %p2782_p5 = scmp.lt.u32.totalorder %s2780_s19, %s2775_s14 }
 0x126   : > { %p2784_p8 = scmp.lt.u32.totalorder %s2775_s14, %s3360_s26 }
 0x127   : > { %p2778_p12 = pnand %p2776_p13, %p3728_p6  ;;  %p2783_p2 = por %p2782_p5, %p2781_p11 }
 0x129   : > { %p2779_p3 = pneg %p2778_p12  ;;  %p2785_p4 = por %p2784_p8, %p2783_p2 }
 0x12b   : > { %p2786_p10 = pnand %p2785_p4, %p2779_p3 }
 0x12d   : > { %2789 = shalt.err (!%p2786_p10)
}
 0x12e   : > { %s2790_s17 = scalar_lea.vmem %s563_s2, 64  ;;  %s2909_s22 = smov [#allocation16]  }
 0x12f   : > { %p2791_p9 = scmp.ne.s32.totalorder %s563_s2, %s2790_s17  ;;  %s2795_s0 = sshll.u32 %s2909_s22, 4  ;;  %s2796_s0 = int_to_ptr.vmem [resolvable:$false] %s2795_s0 }
 0x130   : > { %s2797_s20 = scalar_lea.vmem %s2796_s0, 128  ;;  %p2798_p1 = scmp.lt.s32.totalorder %s563_s2, %s2796_s0 }
 0x131   : > { %p2793_p0 = pnand %p2791_p9, %p3728_p6  ;;  %p2799_p13 = scmp.lt.s32.totalorder %s2797_s20, %s2790_s17 }
 0x133   : > { %p2794_p7 = pneg %p2793_p0  ;;  %p2800_p12 = por %p2799_p13, %p2798_p1 }
 0x135   : > { %p2801_p5 = pnand %p2800_p12, %p2794_p7 }
 0x137   : > { %2804 = shalt.err (!%p2801_p5)
}
 0x138   : > { %p3729_p11 = scmp.ne.s32.totalorder %s3709_s12, 0  ;;  %s3730_s30 = sld [smem:[#allocation28_spill]] }
 0x13a   : > { %2341 = dma.hbm_to_vmem [thread:$0]  (!%p3729_p11), %s3360_s26, 64, %s563_s2, %s3096_s24  }
 0x13e   : > { %p3731_p3 = scmp.ne.s32.totalorder %s3730_s30, 0 }
 0x13f   : > { %s3732_s18 = sld [smem:[#allocation26_spill]] (!%p3731_p3) }
 0x140   : > { %571 = sbr.rel (%p3731_p3) target bundleno = 3508 (0xdb4), region = 64 }
 0x145   : > { %p3733_p6 = scmp.eq.s32.totalorder (!%p3731_p3), %s3732_s18, 0 }
 0x147   : > { %2856 = dma.done.wait (%p3733_p6), [#allocation4], 256   ;;  %p3734_p2 = pmov %p3733_p6 }
 0x149   : > { %2858 = vsyncadd (%p3734_p2), [#allocation4], 4294967040  ;;  %p3735_p8 = pmov %p3734_p2 }
 0x14a   : > { %p3736_p4 = pmov %p3734_p2 }
 0x14b   : > { %2860 = dma.done.wait (%p3735_p8), [#allocation7], 32  }
 0x14c   : > { %2862 = vsyncadd (%p3736_p4), [#allocation7], 4294967264  ;;  %s3737_s12 = sld [smem:[#allocation22_spill]]  ;;  %s3738_s27 = sld [smem:[#allocation27_spill]] }
 0x14d   : > { %s581_s28 = sand.u32 1, %s3732_s18  }
 0x14e   : > { %s582_s4 = scalar_lea.sflag [#allocation4], %s581_s28 }
 0x152   : > { %s3392_s24 = sand.u32 1, %s3737_s12   ;;  %p3739_p10 = scmp.ne.s32.totalorder %s3738_s27, 0 }
 0x153   : > { %s3395_s15 = sshll.u32 %s3392_s24, 4 }
 0x154   : > { %s585_s3 = scalar_lea.vmem [#allocation8], %s3395_s15 }
 0x155   : > { %2864 = dma.done.wait (%p3739_p10), %s582_s4, 1408  }
 0x156   : > { %2866 = vsyncadd (%p3739_p10), %s582_s4, 4294965888  ;;  %s2098_s13 = sshll.u32 %s3392_s24, 5  ;;  %s2099_s26 = sshll.u32 %s3392_s24, 2 }
 0x157   : > { %s593_s10 = scalar_lea.vmem [#allocation9], %s3392_s24  ;;  %s602_s2 = scalar_lea.vmem [#allocation10], %s3395_s15 }
 0x158   : > { %s610_s14 = scalar_lea.vmem [#allocation11], %s3392_s24  ;;  %s619_s29 = scalar_lea.vmem [#allocation12], %s3395_s15 }
 0x159   : > { %s627_s16 = scalar_lea.vmem [#allocation13], %s3392_s24  ;;  %s3409_s19 = scalar_lea.vmem [#allocation14], %s2098_s13 }
 0x15a   : > { %s644_s25 = scalar_lea.vmem [#allocation15], %s3392_s24  ;;  %s3412_s23 = scalar_lea.vmem [#allocation16], %s2099_s26 }
 0x15b   : > { %s3740_s17 = sld [smem:[#allocation24_spill]] }
 0x161   : > { %p2100_p9 = scmp.ne.s32.totalorder %s3740_s17, 0 }
 0x162   : > { %v2151_v0 = vld [vmem:[#allocation3] sm:$0xff] (!%p2100_p9)   ;;  %vm739_vm0 = vcmask (!%p2100_p9), 261120   ;;  %v2158_v1 = vld [vmem:[#allocation3 + $0x8] sm:$0xff] (!%p2100_p9)  }
 0x163   : > { %730 = sbr.rel (%p2100_p9) target bundleno = 362 (0x16a), region = 112  ;;  %v2152_v2 = vunpack.c.l.bf16 (!%p2100_p9), %v2151_v0  ;;  %v2153_v3 = vunpack.c.h.bf16 (!%p2100_p9), %v2151_v0  ;;  %v2156_v4 = vunpack.c.l.bf16 (!%p2100_p9), %v2158_v1  ;;  %v2157_v5 = vunpack.c.h.bf16 (!%p2100_p9), %v2158_v1 }
 0x165   : > { %740 = vst.msk [vmem:[#allocation2] sm:$0xff] (!%p2100_p9), %vm739_vm0, %v2152_v2  ;;  %741 = vst.msk [vmem:[#allocation2 + $0x8] sm:$0xff] (!%p2100_p9), %vm739_vm0, %v2153_v3 }
 0x166   : > { %742 = vst.msk [vmem:[#allocation2 + $0x10] sm:$0xff] (!%p2100_p9), %vm739_vm0, %v2156_v4  ;;  %743 = vst.msk [vmem:[#allocation2 + $0x18] sm:$0xff] (!%p2100_p9), %vm739_vm0, %v2157_v5 }
 0x16a PF: > { %v2413_v6 = vld [vmem:[%s585_s3] sm:$0xff]   ;;  %v2414_v7 = vld [vmem:[%s585_s3 + $0x8] sm:$0xff]   ;;  %vm775_vm1 = vcmask 261120   ;;  %v2910_v14 = vmov 0.0   ;;  %vm2911_vm2 = vmmov 0   ;;  %s2912_s22 = smov 96  }
 0x16b   : > { %2193 = vmatprep.subr.bf16.mxu0 %v2413_v6  ;;  %2201 = vmatprep.subr.bf16.mxu1 %v2910_v14  ;;  %v2101_v16 = vld [vmem:[%s593_s10] ss:$0 sm:$0xff]  ;;  %vm836_vm3 = vcmask 130048   ;;  %v3455_v31 = vld [vmem:[#allocation6] ss:$0 sm:$0xff]  ;;  %s2913_s0 = smov 64  }
 0x16c   : > { %v3415_v8 = vld [vmem:[#allocation2] sm:$0xff]  ;;  %v3417_v9 = vld [vmem:[#allocation2 + $0x8] sm:$0xff]  ;;  %2194 = vmatpush3.bf16.msra.mxu0 %v2413_v6  ;;  %2203 = vmatprep.mubr.msk.bf16.mxu1 %vm2911_vm2, %v2910_v14  ;;  %v3458_v39 = vld [vmem:[#allocation6 + $0x1] ss:$0 sm:$0xff]  ;;  %s2914_s20 = smov 80   ;;  %s2915_s30 = smov 112  }
 0x16d   : > { %v3419_v10 = vld [vmem:[#allocation2 + $0x10] sm:$0xff]  ;;  %v750_v11 = vpack.c.bf16 %v3417_v9, %v3415_v8  ;;  %v3423_v12 = vld [vmem:[#allocation2 + $0x18] sm:$0xff]  ;;  %2195 = vmatprep.subr.bf16.mxu0 %v2414_v7  ;;  %s2916_s18 = smov 48   ;;  %s2917_s12 = smov 16   ;;  %vm1667_vm4 = vcmask 523264  }
 0x16e   : > { %v751_v13 = vpack.c.bf16 %v3423_v12, %v3419_v10  ;;  %s3741_s27 = sld [smem:[#allocation24_spill]] }
 0x16f   : > { %2197 = vmatprep.mubr.msk.bf16.mxu0 %vm775_vm1, %v750_v11 }
 0x170   : > { %2196 = vmatpush3.bf16.msra.mxu0 %v2414_v7 }
 0x171   : > { %2207 = vmatprep.subr.bf16.mxu0 %v2910_v14 }
 0x173   : > { %2198 = vmatmul.mubr.msk.bf16.vlgmr.msra.gmra.mrb[0].mxu0 %vm775_vm1, %v751_v13 }
 0x174   : > { %2209 = vmatprep.mubr.msk.bf16.mxu0 %vm2911_vm2, %v2910_v14  ;;  %p2133_p0 = scmp.ne.s32.totalorder %s3741_s27, 1 }
 0x175   : > { %vm1819_vm5 = vcmask (!%p2133_p0), 257024  }
 0x246   : > { %v2199_v15 = vpop.f32.mrb[0].mxu0 }
 0x247   : > { %v816_v17 = vpop.f32.mrb[1].mxu0  ;;  %v825_v19 = vadd.f32 %v2199_v15, %v2101_v16 }
 0x248   : > { %v2200_v18 = vpop.f32.mrb[2].mxu0  ;;  %v817_v22 = vadd.f32 %v2101_v16, %v816_v17 }
 0x249   : > { %v828_v20 = vadd.f32 %v2200_v18, %v2101_v16  ;;  %v819_v21 = vpop.f32.mrb[3].mxu0 }
 0x24a   : > { %v820_v23 = vadd.f32 %v2101_v16, %v819_v21 }
 0x24b   : > { %v3437_v24 = vpack.c.bf16 %v828_v20, %v825_v19 }
 0x24c   : > { %v3439_v25 = vpack.c.bf16 %v820_v23, %v817_v22 }
 0x24e   : > { %834 = vrot.lane.b32.xlu0 %v3439_v25, %s2912_s22 }
 0x252   : > { %885 = vrot.lane.b32.xlu0 %v3437_v24, %s2912_s22 }
 0x2c0   : > { %v835_v26 = vpop.permute.xlu0 %834 }
 0x2c1   : > { %v841_v27 = vsel %vm836_vm3, %v835_v26, 0 }
 0x2c2   : > { %2202 = vmatpush3.bf16.xpose.msra.mxu1 %v841_v27 }
 0x2c3   : > { %2213 = vmatprep.subr.bf16.mxu1 %v2910_v14 }
 0x2c4   : > { %v886_v28 = vpop.permute.xlu0 %885 }
 0x2c5   : > { %v891_v29 = vsel %vm836_vm3, %v886_v28, 0 }
 0x2c6   : > { %2208 = vmatpush3.bf16.xpose.msra.mxu0 %v891_v29 }
 0x2c7   : > { %2219 = vmatprep.subr.bf16.mxu0 %v2910_v14 }
 0x2c9   : > { %2204 = vmatmul.mubr.msk.bf16.vlgmr.msra.gmra.mrb[0].mxu1 %vm836_vm3, %v3439_v25 }
 0x2ca   : > { %2215 = vmatprep.mubr.msk.bf16.mxu1 %vm2911_vm2, %v2910_v14 }
 0x2cd   : > { %2210 = vmatmul.mubr.msk.bf16.vlgmr.msra.gmra.mrb[4].mxu0 %vm836_vm3, %v3437_v24 }
 0x2ce   : > { %2221 = vmatprep.mubr.msk.bf16.mxu0 %vm2911_vm2, %v2910_v14 }
 0x39c   : > { %v877_v30 = vpop.f32.mrb[0].mxu1 }
 0x39d   : > { %v934_v32 = vmul.f32 0.25, %v877_v30  ;;  %v2205_v33 = vpop.f32.mrb[1].mxu1 }
 0x39e   : > { %v880_v34 = vpop.f32.mrb[2].mxu1 }
 0x39f   : > { %v935_v35 = vmul.f32 0.25, %v880_v34  ;;  %v2206_v36 = vpop.f32.mrb[3].mxu1  ;;  %v950_v37 = vadd.f32 %v3455_v31, %v934_v32 }
 0x3a0   : > { %v927_v38 = vpop.f32.mrb[4].mxu0 }
 0x3a1   : > { %v936_v40 = vmul.f32 0.25, %v927_v38  ;;  %v2211_v41 = vpop.f32.mrb[5].mxu0  ;;  %v954_v42 = vsel %vm836_vm3, %v950_v37, -inf  ;;  %v951_v43 = vadd.f32 %v3455_v31, %v935_v35 }
 0x3a2   : > { %955 = vmax.xlane.f32.xlu1 %v954_v42  ;;  %v930_v44 = vpop.f32.mrb[6].mxu0 }
 0x3a3   : > { %v937_v45 = vmul.f32 0.25, %v930_v44  ;;  %v2212_v46 = vpop.f32.mrb[7].mxu0  ;;  %v952_v47 = vadd.f32 %v3458_v39, %v936_v40  ;;  %v957_v48 = vsel %vm836_vm3, %v951_v43, -inf }
 0x3a5   : > { %v960_v49 = vsel %vm836_vm3, %v952_v47, -inf  ;;  %v953_v50 = vadd.f32 %v3458_v39, %v937_v45 }
 0x3a6   : > { %958 = vmax.xlane.f32.xlu1 %v957_v48  ;;  %961 = vmax.xlane.f32.xlu0 %v960_v49 }
 0x3a7   : > { %v963_v51 = vsel %vm836_vm3, %v953_v50, -inf }
 0x3aa   : > { %964 = vmax.xlane.f32.xlu1 %v963_v51 }
 0x3bb   : > { %1000 = vrot.lane.b32.xlu1 %v3439_v25, %s2913_s0 }
 0x3bc   : > { %1047 = vrot.lane.b32.xlu0 %v3437_v24, %s2913_s0 }
 0x3bf   : > { %1098 = vrot.lane.b32.xlu1 %v3439_v25, %s2914_s20 }
 0x3c3   : > { %1149 = vrot.lane.b32.xlu1 %v3437_v24, %s2914_s20 }
 0x42f   : > { %v956_v52 = vpop.xlane.xlu1 %955 }
 0x430   : > { %v966_v53 = vsub.f32 %v950_v37, %v956_v52 }
 0x432   : > { %v970_v58 = vmul.f32 1.442695, %v966_v53 }
 0x433   : > { %v959_v54 = vpop.xlane.xlu1 %958  ;;  %v962_v55 = vpop.xlane.xlu0 %961 }
 0x434   : > { %v968_v56 = vsub.f32 %v952_v47, %v962_v55  ;;  %v967_v62 = vsub.f32 %v951_v43, %v959_v54 }
 0x436   : > { %v974_v57 = vmul.f32 1.442695, %v968_v56  ;;  %v972_v1 = vmul.f32 1.442695, %v967_v62 }
 0x437   : > { %v1048_v59 = vpop.permute.xlu0 %1047  ;;  %v965_v60 = vpop.xlane.xlu1 %964 }
 0x438   : > { %v969_v61 = vsub.f32 %v953_v50, %v965_v60  ;;  %2220 = vmatpush3.bf16.msra.mxu0 %v1048_v59  ;;  %2423 = vpow2.f32 %v974_v57 }
 0x439   : > { %2231 = vmatprep.subr.bf16.mxu0 %v2910_v14  ;;  %2425 = vpow2.f32 %v970_v58 }
 0x43a   : > { %v976_v63 = vmul.f32 1.442695, %v969_v61 }
 0x43b   : > { %v1001_v0 = vpop.permute.xlu1 %1000 }
 0x43c   : > { %2214 = vmatpush3.bf16.msra.mxu1 %v1001_v0  ;;  %2427 = vpow2.f32 %v976_v63 }
 0x43d   : > { %2225 = vmatprep.subr.bf16.mxu1 %v2910_v14  ;;  %2429 = vpow2.f32 %v972_v1 }
 0x43f   : > { %v1099_v15 = vpop.permute.xlu1 %1098 }
 0x440   : > { %v1104_v36 = vsel %vm836_vm3, %v1099_v15, 0 }
 0x442   : > { %v2424_v2 = vpop.eup %2423 }
 0x443   : > { %v984_v3 = vsel %vm836_vm3, %v2424_v2, 0.0  ;;  %v2426_v4 = vpop.eup %2425  ;;  %v1150_v16 = vpop.permute.xlu1 %1149 }
 0x444   : > { %985 = vadd.xlane.f32.xlu1 %v984_v3  ;;  %v978_v5 = vsel %vm836_vm3, %v2426_v4, 0.0  ;;  %v1155_v30 = vsel %vm836_vm3, %v1150_v16, 0 }
 0x446   : > { %v2428_v6 = vpop.eup %2427 }
 0x447   : > { %v987_v7 = vsel %vm836_vm3, %v2428_v6, 0.0  ;;  %v2430_v11 = vpop.eup %2429 }
 0x448   : > { %979 = vadd.xlane.f32.xlu1 %v978_v5  ;;  %v981_v13 = vsel %vm836_vm3, %v2430_v11, 0.0 }
 0x44c   : > { %988 = vadd.xlane.f32.xlu1 %v987_v7 }
 0x450   : > { %982 = vadd.xlane.f32.xlu1 %v981_v13 }
 0x461   : > { %1096 = vrot.lane.b32.xlu1 %v3439_v25, %s2915_s30 }
 0x465   : > { %1147 = vrot.lane.b32.xlu1 %v3437_v24, %s2915_s30 }
 0x4d1   : > { %v986_v17 = vpop.xlane.xlu1 %985 }
 0x4d2   : > { %2431 = vrcp.f32 %v986_v17 }
 0x4d5   : > { %v980_v18 = vpop.xlane.xlu1 %979 }
 0x4d9   : > { %v989_v19 = vpop.xlane.xlu1 %988 }
 0x4da   : > { %2433 = vrcp.f32 %v989_v19 }
 0x4db   : > { %2435 = vrcp.f32 %v980_v18 }
 0x4dc   : > { %v2432_v21 = vpop.eup %2431 }
 0x4dd   : > { %v983_v20 = vpop.xlane.xlu1 %982  ;;  %v996_v23 = vmul.f32 %v2432_v21, %v2424_v2 }
 0x4de   : > { %2437 = vrcp.f32 %v983_v20 }
 0x4e1   : > { %v1097_v34 = vpop.permute.xlu1 %1096 }
 0x4e4   : > { %v2434_v22 = vpop.eup %2433 }
 0x4e5   : > { %v997_v26 = vmul.f32 %v2434_v22, %v2428_v6  ;;  %v2436_v27 = vpop.eup %2435  ;;  %v1148_v37 = vpop.permute.xlu1 %1147 }
 0x4e6   : > { %v994_v32 = vmul.f32 %v2436_v27, %v2426_v4 }
 0x4e7   : > { %v999_v28 = vpack.c.bf16 %v997_v26, %v996_v23 }
 0x4e8   : > { %v2438_v29 = vpop.eup %2437 }
 0x4e9   : > { %v995_v33 = vmul.f32 %v2438_v29, %v2430_v11  ;;  %2222 = vmatmul.mubr.msk.bf16.vlgmr.msra.gmra.mrb[8].mxu0 %vm836_vm3, %v999_v28 }
 0x4ea   : > { %2232 = vmatpush3.bf16.xpose.msra.mxu0 %v1155_v30  ;;  %2233 = vmatprep.mubr.msk.bf16.mxu0 %vm2911_vm2, %v2910_v14 }
 0x4eb   : > { %v998_v35 = vpack.c.bf16 %v995_v33, %v994_v32  ;;  %2243 = vmatprep.subr.bf16.mxu0 %v2910_v14 }
 0x4ed   : > { %2216 = vmatmul.mubr.msk.bf16.vlgmr.msra.gmra.mrb[4].mxu1 %vm836_vm3, %v998_v35 }
 0x4ee   : > { %2226 = vmatpush3.bf16.xpose.msra.mxu1 %v1104_v36  ;;  %2227 = vmatprep.mubr.msk.bf16.mxu1 %vm2911_vm2, %v2910_v14 }
 0x4ef   : > { %2237 = vmatprep.subr.bf16.mxu1 %v2910_v14 }
 0x4f1   : > { %2234 = vmatmul.mubr.msk.bf16.vlgmr.msra.gmra.mrb[12].mxu0 %vm836_vm3, %v1148_v37 }
 0x4f2   : > { %2245 = vmatprep.mubr.msk.bf16.mxu0 %vm2911_vm2, %v2910_v14 }
 0x4f5   : > { %2228 = vmatmul.mubr.msk.bf16.vlgmr.msra.gmra.mrb[8].mxu1 %vm836_vm3, %v1097_v34 }
 0x4f6   : > { %2239 = vmatprep.mubr.msk.bf16.mxu1 %vm2911_vm2, %v2910_v14 }
 0x5bc   : > { %v3497_v38 = vpop.f32.mrb[8].mxu0 }
 0x5bd   : > { %v2223_v40 = vpop.f32.mrb[9].mxu0 }
 0x5be   : > { %v3499_v41 = vpop.f32.mrb[10].mxu0 }
 0x5bf   : > { %v1095_v42 = vpack.c.bf16 %v3499_v41, %v3497_v38  ;;  %v2224_v43 = vpop.f32.mrb[11].mxu0 }
 0x5c0   : > { %v3503_v44 = vpop.f32.mrb[4].mxu1 }
 0x5c1   : > { %v2217_v45 = vpop.f32.mrb[5].mxu1 }
 0x5c2   : > { %v3505_v46 = vpop.f32.mrb[6].mxu1 }
 0x5c3   : > { %v1094_v47 = vpack.c.bf16 %v3505_v46, %v3503_v44  ;;  %v2218_v48 = vpop.f32.mrb[7].mxu1 }
 0x5c4   : > { %v1191_v49 = vpop.f32.mrb[12].mxu0 }
 0x5c5   : > { %v2235_v14 = vpop.f32.mrb[13].mxu0  ;;  %v1200_v53 = vmul.f32 0.25, %v1191_v49 }
 0x5c6   : > { %v1194_v50 = vpop.f32.mrb[14].mxu0 }
 0x5c7   : > { %v2236_v51 = vpop.f32.mrb[15].mxu0  ;;  %v1201_v60 = vmul.f32 0.25, %v1194_v50  ;;  %v1204_v63 = vadd.f32 %v3458_v39, %v1200_v53  ;;  %v2415_v50 = vld [vmem:[%s602_s2] sm:$0xff]  }
 0x5c8   : > { %v1140_v52 = vpop.f32.mrb[8].mxu1  ;;  %v2416_v51 = vld [vmem:[%s602_s2 + $0x8] sm:$0xff]  }
 0x5c9   : > { %v1198_v54 = vmul.f32 0.25, %v1140_v52  ;;  %v2229_v55 = vpop.f32.mrb[9].mxu1  ;;  %v1212_v1 = vsel %vm836_vm3, %v1204_v63, -inf  ;;  %v1205_v2 = vadd.f32 %v3458_v39, %v1201_v60 }
 0x5ca   : > { %v1143_v56 = vpop.f32.mrb[10].mxu1 }
 0x5cb   : > { %v1199_v57 = vmul.f32 0.25, %v1143_v56  ;;  %v2230_v58 = vpop.f32.mrb[11].mxu1  ;;  %v1202_v59 = vadd.f32 %v3455_v31, %v1198_v54  ;;  %v1215_v3 = vsel %vm836_vm3, %v1205_v2, -inf }
 0x5cd   : > { %v1206_v61 = vsel %vm836_vm3, %v1202_v59, -inf  ;;  %v1203_v62 = vadd.f32 %v3455_v31, %v1199_v57 }
 0x5ce   : > { %1207 = vmax.xlane.f32.xlu0 %v1206_v61 }
 0x5cf   : > { %v1209_v0 = vsel %vm836_vm3, %v1203_v62, -inf }
 0x5d0   : > { %1210 = vmax.xlane.f32.xlu1 %v1209_v0 }
 0x5d2   : > { %1213 = vmax.xlane.f32.xlu0 %v1212_v1 }
 0x5d6   : > { %1216 = vmax.xlane.f32.xlu0 %v1215_v3 }
 0x65b   : > { %v1208_v4 = vpop.xlane.xlu0 %1207 }
 0x65c   : > { %v1218_v5 = vsub.f32 %v1202_v59, %v1208_v4 }
 0x65d   : > { %v1211_v6 = vpop.xlane.xlu1 %1210 }
 0x65e   : > { %v1222_v31 = vmul.f32 1.442695, %v1218_v5  ;;  %v1219_v13 = vsub.f32 %v1203_v62, %v1211_v6 }
 0x65f   : > { %v1214_v7 = vpop.xlane.xlu0 %1213 }
 0x660   : > { %v1220_v11 = vsub.f32 %v1204_v63, %v1214_v7  ;;  %v1224_v18 = vmul.f32 1.442695, %v1219_v13 }
 0x662   : > { %v1226_v15 = vmul.f32 1.442695, %v1220_v11 }
 0x663   : > { %v1217_v16 = vpop.xlane.xlu0 %1216 }
 0x664   : > { %2439 = vpow2.f32 %v1226_v15  ;;  %v1221_v17 = vsub.f32 %v1205_v2, %v1217_v16  ;;  %v2116_v2 = vld [vmem:[%s610_s14] ss:$0 sm:$0xff] }
 0x665   : > { %2441 = vpow2.f32 %v1222_v31 }
 0x666   : > { %v1228_v19 = vmul.f32 1.442695, %v1221_v17 }
 0x668   : > { %2443 = vpow2.f32 %v1228_v19 }
 0x669   : > { %2445 = vpow2.f32 %v1224_v18 }
 0x66e   : > { %v2440_v39 = vpop.eup %2439 }
 0x66f   : > { %v1236_v20 = vsel %vm836_vm3, %v2440_v39, 0.0  ;;  %v2442_v21 = vpop.eup %2441 }
 0x670   : > { %1237 = vadd.xlane.f32.xlu1 %v1236_v20  ;;  %v1230_v23 = vsel %vm836_vm3, %v2442_v21, 0.0 }
 0x672   : > { %v2444_v22 = vpop.eup %2443 }
 0x673   : > { %v1239_v26 = vsel %vm836_vm3, %v2444_v22, 0.0  ;;  %v2446_v27 = vpop.eup %2445 }
 0x674   : > { %1231 = vadd.xlane.f32.xlu1 %v1230_v23  ;;  %1240 = vadd.xlane.f32.xlu0 %v1239_v26  ;;  %v1233_v28 = vsel %vm836_vm3, %v2446_v27, 0.0 }
 0x678   : > { %1234 = vadd.xlane.f32.xlu0 %v1233_v28 }
 0x685   : > { %1252 = vrot.lane.b32.xlu1 %v3439_v25, %s2916_s18 }
 0x68e   : > { %1299 = vrot.lane.b32.xlu0 %v3437_v24, %s2916_s18 }
 0x6fd   : > { %v1238_v29 = vpop.xlane.xlu1 %1237 }
 0x6fe   : > { %2447 = vrcp.f32 %v1238_v29 }
 0x701   : > { %v1232_v30 = vpop.xlane.xlu1 %1231  ;;  %v1241_v32 = vpop.xlane.xlu0 %1240 }
 0x702   : > { %2449 = vrcp.f32 %v1241_v32 }
 0x703   : > { %2451 = vrcp.f32 %v1232_v30 }
 0x705   : > { %v1253_v33 = vpop.permute.xlu1 %1252  ;;  %v1235_v34 = vpop.xlane.xlu0 %1234 }
 0x706   : > { %2453 = vrcp.f32 %v1235_v34  ;;  %2238 = vmatpush3.bf16.msra.mxu1 %v1253_v33 }
 0x707   : > { %2249 = vmatprep.subr.bf16.mxu1 %v2415_v50 }
 0x708   : > { %v2448_v36 = vpop.eup %2447 }
 0x709   : > { %v1300_v35 = vpop.permute.xlu0 %1299  ;;  %v1248_v25 = vmul.f32 %v2448_v36, %v2440_v39  ;;  %v2418_v36 = vld [vmem:[%s619_s29 + $0x8] sm:$0xff]  }
 0x70a   : > { %2244 = vmatpush3.bf16.msra.mxu0 %v1300_v35  ;;  %v2417_v35 = vld [vmem:[%s619_s29] sm:$0xff]  }
 0x70b   : > { %2257 = vmatprep.subr.bf16.mxu0 %v2417_v35 }
 0x70c   : > { %v2450_v37 = vpop.eup %2449 }
 0x70d   : > { %v2452_v40 = vpop.eup %2451  ;;  %v1249_v43 = vmul.f32 %v2450_v37, %v2444_v22 }
 0x70e   : > { %v1246_v48 = vmul.f32 %v2452_v40, %v2442_v21 }
 0x70f   : > { %v1251_v45 = vpack.c.bf16 %v1249_v43, %v1248_v25  ;;  %v1494_v43 = vlaneseq }
 0x710   : > { %v2454_v24 = vpop.eup %2453 }
 0x711   : > { %v1247_v49 = vmul.f32 %v2454_v24, %v2446_v27  ;;  %2246 = vmatmul.mubr.msk.bf16.vlgmr.msra.gmra.mrb[16].mxu0 %vm836_vm3, %v1251_v45 }
 0x712   : > { %2258 = vmatpush3.bf16.msra.mxu0 %v2417_v35 }
 0x713   : > { %v1250_v14 = vpack.c.bf16 %v1247_v49, %v1246_v48  ;;  %2259 = vmatprep.subr.bf16.mxu0 %v2418_v36 }
 0x715   : > { %2240 = vmatmul.mubr.msk.bf16.vlgmr.msra.gmra.mrb[12].mxu1 %vm836_vm3, %v1250_v14 }
 0x716   : > { %2250 = vmatpush3.bf16.msra.mxu1 %v2415_v50  ;;  %2260 = vmatpush3.bf16.msra.mxu0 %v2418_v36  ;;  %v3557_v50 = vshrl.u32 %v1494_v43, 7 }
 0x717   : > { %2251 = vmatprep.subr.bf16.mxu1 %v2416_v51 }
 0x71a   : > { %2252 = vmatpush3.bf16.msra.mxu1 %v2416_v51 }
 0x7e4   : > { %v1339_v52 = vpop.f32.mrb[16].mxu0 }
 0x7e5   : > { %v2247_v53 = vpop.f32.mrb[17].mxu0 }
 0x7e6   : > { %v1342_v54 = vpop.f32.mrb[18].mxu0 }
 0x7e7   : > { %v1347_v55 = vpack.c.bf16 %v1342_v54, %v1339_v52  ;;  %v2248_v56 = vpop.f32.mrb[19].mxu0  ;;  %v1496_v54 = vsub.s32 0, %v3557_v50 }
 0x7e8   : > { %v1292_v57 = vpop.f32.mrb[12].mxu1 }
 0x7e9   : > { %v2241_v58 = vpop.f32.mrb[13].mxu1 }
 0x7ea   : > { %v1295_v59 = vpop.f32.mrb[14].mxu1  ;;  %v1504_v58 = vsub.s32 1, %v3557_v50 }
 0x7eb   : > { %v1346_v60 = vpack.c.bf16 %v1295_v59, %v1292_v57  ;;  %v2242_v61 = vpop.f32.mrb[15].mxu1 }
 0x7ed   : > { %1350 = vrot.lane.b32.xlu1 %v1346_v60, %s2917_s12 }
 0x7f1   : > { %1352 = vrot.lane.b32.xlu1 %v1347_v55, %s2917_s12  ;;  %v3561_v55 = vld [vmem:[%s3412_s23] sm:$0xf] }
 0x7f2   : > { %v1497_v57 = vrot.slane %v3561_v55, %v1496_v54 }
 0x85f   : > { %v1351_v62 = vpop.permute.xlu1 %1350 }
 0x860   : > { %v1356_v63 = vsel %vm836_vm3, %v1094_v47, %v1351_v62 }
 0x861   : > { %2253 = vmatprep.mubr.msk.bf16.mxu1 %vm775_vm1, %v1356_v63 }
 0x863   : > { %v1353_v0 = vpop.permute.xlu1 %1352 }
 0x864   : > { %v1359_v1 = vsel %vm836_vm3, %v1095_v42, %v1353_v0  ;;  %v1505_v0 = vrot.slane %v3561_v55, %v1504_v58 }
 0x865   : > { %2254 = vmatmul.mubr.msk.bf16.vlgmr.msra.gmra.mrb[16].mxu1 %vm775_vm1, %v1359_v1 }
 0x938   : > { %v2255_v3 = vpop.f32.mrb[16].mxu1 }
 0x939   : > { %v1421_v4 = vpop.f32.mrb[17].mxu1  ;;  %v1430_v5 = vadd.f32 %v2255_v3, %v2116_v2 }
 0x93a   : > { %v1422_v6 = vadd.f32 %v2116_v2, %v1421_v4  ;;  %v2256_v7 = vpop.f32.mrb[18].mxu1 }
 0x93b   : > { %v1424_v44 = vpop.f32.mrb[19].mxu1  ;;  %v1433_v11 = vadd.f32 %v2256_v7, %v2116_v2  ;;  %v1439_v41 = vadd.f32 %v1430_v5, %v3419_v10 }
 0x93c   : > { %v1425_v46 = vadd.f32 %v2116_v2, %v1424_v44  ;;  %v1437_v47 = vadd.f32 %v1422_v6, %v3415_v8 }
 0x93d   : > { %v1447_v13 = vsel %vm775_vm1, %v1439_v41, 0.0  ;;  %v1440_v15 = vadd.f32 %v1433_v11, %v3423_v12 }
 0x93e   : > { %v1441_v31 = vsel %vm775_vm1, %v1437_v47, 0.0  ;;  %v1438_v38 = vadd.f32 %v1425_v46, %v3417_v9 }
 0x93f   : > { %1442 = vadd.xlane.f32.xlu0 %v1441_v31  ;;  %v1450_v16 = vsel %vm775_vm1, %v1440_v15, 0.0 }
 0x940   : > { %v1444_v42 = vsel %vm775_vm1, %v1438_v38, 0.0 }
 0x941   : > { %1445 = vadd.xlane.f32.xlu1 %v1444_v42  ;;  %v2420_v42 = vld [vmem:[%s3409_s19 + $0x8] sm:$0xff]  }
 0x943   : > { %1448 = vadd.xlane.f32.xlu0 %v1447_v13  ;;  %v2421_v13 = vld [vmem:[%s3409_s19 + $0x10] sm:$0xff]  }
 0x947   : > { %1451 = vadd.xlane.f32.xlu0 %v1450_v16  ;;  %v2121_v16 = vld [vmem:[%s627_s16] ss:$0 sm:$0xff] }
 0x9cc   : > { %v1443_v8 = vpop.xlane.xlu0 %1442 }
 0x9cd   : > { %v1454_v17 = vmul.f32 0.03125, %v1443_v8 }
 0x9ce   : > { %v1446_v18 = vpop.xlane.xlu1 %1445 }
 0x9cf   : > { %v1458_v19 = vsub.f32 %v1437_v47, %v1454_v17  ;;  %v1455_v39 = vmul.f32 0.03125, %v1446_v18 }
 0x9d0   : > { %v1449_v9 = vpop.xlane.xlu0 %1448 }
 0x9d1   : > { %v1459_v20 = vsub.f32 %v1438_v38, %v1455_v39  ;;  %v1456_v10 = vmul.f32 0.03125, %v1449_v9  ;;  %v1462_v21 = vmul.f32 %v1458_v19, %v1458_v19 }
 0x9d3   : > { %v1460_v22 = vsub.f32 %v1439_v41, %v1456_v10  ;;  %v1466_v23 = vsel %vm775_vm1, %v1462_v21, 0.0  ;;  %v1463_v26 = vmul.f32 %v1459_v20, %v1459_v20  ;;  %v2419_v41 = vld [vmem:[%s3409_s19] sm:$0xff]  }
 0x9d4   : > { %1467 = vadd.xlane.f32.xlu1 %v1466_v23  ;;  %v1452_v12 = vpop.xlane.xlu0 %1451  ;;  %2265 = vmatprep.subr.bf16.mxu1 %v2419_v41 }
 0x9d5   : > { %v1457_v27 = vmul.f32 0.03125, %v1452_v12  ;;  %v1469_v28 = vsel %vm775_vm1, %v1463_v26, 0.0  ;;  %v1464_v29 = vmul.f32 %v1460_v22, %v1460_v22  ;;  %2266 = vmatpush3.bf16.msra.mxu1 %v2419_v41 }
 0x9d6   : > { %1470 = vadd.xlane.f32.xlu0 %v1469_v28  ;;  %2267 = vmatprep.subr.bf16.mxu1 %v2420_v42 }
 0x9d7   : > { %v1461_v30 = vsub.f32 %v1440_v15, %v1457_v27  ;;  %v1472_v32 = vsel %vm775_vm1, %v1464_v29, 0.0  ;;  %v2422_v15 = vld [vmem:[%s3409_s19 + $0x18] sm:$0xff]  }
 0x9d8   : > { %1473 = vadd.xlane.f32.xlu1 %v1472_v32 }
 0x9d9   : > { %v1465_v33 = vmul.f32 %v1461_v30, %v1461_v30  ;;  %2268 = vmatpush3.bf16.msra.mxu1 %v2420_v42 }
 0x9da   : > { %2269 = vmatprep.subr.bf16.mxu1 %v2421_v13 }
 0x9db   : > { %v1475_v34 = vsel %vm775_vm1, %v1465_v33, 0.0 }
 0x9dc   : > { %1476 = vadd.xlane.f32.xlu0 %v1475_v34 }
 0x9dd   : > { %2270 = vmatpush3.bf16.msra.mxu1 %v2421_v13 }
 0x9de   : > { %2271 = vmatprep.subr.bf16.mxu1 %v2422_v15 }
 0x9e1   : > { %2272 = vmatpush3.bf16.msra.mxu1 %v2422_v15 }
 0xa61   : > { %v1468_v37 = vpop.xlane.xlu1 %1467 }
 0xa62   : > { %v1478_v40 = vmul.f32 0.03125, %v1468_v37 }
 0xa63   : > { %v1471_v25 = vpop.xlane.xlu0 %1470 }
 0xa64   : > { %v1482_v24 = vadd.f32 1e-12, %v1478_v40  ;;  %v1479_v45 = vmul.f32 0.03125, %v1471_v25 }
 0xa65   : > { %v1474_v48 = vpop.xlane.xlu1 %1473 }
 0xa66   : > { %2455 = vrsqrt.f32 %v1482_v24  ;;  %v1483_v49 = vadd.f32 1e-12, %v1479_v45  ;;  %v1480_v14 = vmul.f32 0.03125, %v1474_v48 }
 0xa68   : > { %2457 = vrsqrt.f32 %v1483_v49  ;;  %v1484_v51 = vadd.f32 1e-12, %v1480_v14 }
 0xa69   : > { %v1477_v52 = vpop.xlane.xlu0 %1476 }
 0xa6a   : > { %2459 = vrsqrt.f32 %v1484_v51  ;;  %v1481_v53 = vmul.f32 0.03125, %v1477_v52 }
 0xa6c   : > { %v1485_v56 = vadd.f32 1e-12, %v1481_v53 }
 0xa6e   : > { %2461 = vrsqrt.f32 %v1485_v56 }
 0xa70   : > { %v2456_v59 = vpop.eup %2455 }
 0xa71   : > { %v1490_v60 = vmul.f32 %v2456_v59, %v1458_v19 }
 0xa72   : > { %v2458_v61 = vpop.eup %2457 }
 0xa73   : > { %v1491_v62 = vmul.f32 %v2458_v61, %v1459_v20  ;;  %v1498_v63 = vmul.f32 %v1497_v57, %v1490_v60 }
 0xa74   : > { %v2460_v1 = vpop.eup %2459 }
 0xa75   : > { %v1492_v2 = vmul.f32 %v2460_v1, %v1460_v22  ;;  %v1499_v3 = vmul.f32 %v1497_v57, %v1491_v62  ;;  %v3566_v4 = vadd.f32 %v1505_v0, %v1498_v63 }
 0xa77   : > { %v3568_v5 = vadd.f32 %v1505_v0, %v1499_v3  ;;  %v1500_v7 = vmul.f32 %v1497_v57, %v1492_v2  ;;  %v2126_v3 = vld [vmem:[%s644_s25] ss:$0 sm:$0xff] }
 0xa78   : > { %v2462_v6 = vpop.eup %2461 }
 0xa79   : > { %v1493_v44 = vmul.f32 %v2462_v6, %v1461_v30  ;;  %v1510_v46 = vpack.c.bf16 %v3568_v5, %v3566_v4  ;;  %v3573_v11 = vadd.f32 %v1505_v0, %v1500_v7 }
 0xa7b   : > { %v1501_v47 = vmul.f32 %v1497_v57, %v1493_v44  ;;  %2261 = vmatprep.mubr.msk.bf16.mxu0 %vm775_vm1, %v1510_v46 }
 0xa7d   : > { %v3575_v31 = vadd.f32 %v1505_v0, %v1501_v47 }
 0xa7f   : > { %v1511_v38 = vpack.c.bf16 %v3575_v31, %v3573_v11 }
 0xa81   : > { %2262 = vmatmul.mubr.msk.bf16.vlgmr.msra.gmra.mrb[20].mxu0 %vm775_vm1, %v1511_v38 }
 0xb54   : > { %v2263_v8 = vpop.f32.mrb[20].mxu0 }
 0xb55   : > { %v1584_v17 = vadd.f32 %v2263_v8, %v2121_v16  ;;  %v1575_v18 = vpop.f32.mrb[21].mxu0 }
 0xb56   : > { %v1576_v19 = vadd.f32 %v2121_v16, %v1575_v18  ;;  %v2264_v39 = vpop.f32.mrb[22].mxu0 }
 0xb57   : > { %v1596_v9 = vmul.f32 0.044715, %v1584_v17  ;;  %v1587_v20 = vadd.f32 %v2264_v39, %v2121_v16  ;;  %v1578_v10 = vpop.f32.mrb[23].mxu0  ;;  %v1592_v54 = vmul.f32 0.5, %v1584_v17 }
 0xb58   : > { %v1594_v21 = vmul.f32 0.044715, %v1576_v19  ;;  %v1579_v22 = vadd.f32 %v2121_v16, %v1578_v10  ;;  %v1590_v58 = vmul.f32 0.5, %v1576_v19 }
 0xb59   : > { %v1600_v23 = vmul.f32 %v1596_v9, %v1584_v17  ;;  %v1597_v26 = vmul.f32 0.044715, %v1587_v20  ;;  %v1593_v56 = vmul.f32 0.5, %v1587_v20 }
 0xb5a   : > { %v1598_v12 = vmul.f32 %v1594_v21, %v1576_v19  ;;  %v1595_v27 = vmul.f32 0.044715, %v1579_v22  ;;  %v1591_v59 = vmul.f32 0.5, %v1579_v22 }
 0xb5b   : > { %v1604_v28 = vmul.f32 %v1600_v23, %v1584_v17  ;;  %v1601_v29 = vmul.f32 %v1597_v26, %v1587_v20 }
 0xb5c   : > { %v1602_v30 = vmul.f32 %v1598_v12, %v1576_v19  ;;  %v1599_v32 = vmul.f32 %v1595_v27, %v1579_v22 }
 0xb5d   : > { %v1608_v33 = vadd.f32 %v1604_v28, %v1584_v17  ;;  %v1605_v34 = vmul.f32 %v1601_v29, %v1587_v20 }
 0xb5e   : > { %v1606_v35 = vadd.f32 %v1602_v30, %v1576_v19  ;;  %v1603_v36 = vmul.f32 %v1599_v32, %v1579_v22 }
 0xb5f   : > { %v1612_v37 = vmul.f32 0.7978846, %v1608_v33  ;;  %v1609_v40 = vadd.f32 %v1605_v34, %v1587_v20 }
 0xb60   : > { %v1610_v25 = vmul.f32 0.7978846, %v1606_v35  ;;  %v1607_v43 = vadd.f32 %v1603_v36, %v1579_v22 }
 0xb61   : > { %2463 = vtanh.f32 %v1612_v37  ;;  %v1613_v24 = vmul.f32 0.7978846, %v1609_v40 }
 0xb62   : > { %2465 = vtanh.f32 %v1610_v25  ;;  %v1611_v45 = vmul.f32 0.7978846, %v1607_v43 }
 0xb63   : > { %2467 = vtanh.f32 %v1613_v24 }
 0xb64   : > { %2469 = vtanh.f32 %v1611_v45 }
 0xb6b   : > { %v2464_v48 = vpop.eup %2463 }
 0xb6c   : > { %v2466_v49 = vpop.eup %2465  ;;  %v1620_v14 = vadd.f32 1.0, %v2464_v48 }
 0xb6d   : > { %v2468_v51 = vpop.eup %2467  ;;  %v1618_v52 = vadd.f32 1.0, %v2466_v49 }
 0xb6e   : > { %v2470_v53 = vpop.eup %2469  ;;  %v1621_v57 = vadd.f32 1.0, %v2468_v51  ;;  %v1624_v61 = vmul.f32 %v1620_v14, %v1592_v54  ;;  %v1789_v54 = vsub.s32 3, %v3557_v50 }
 0xb6f   : > { %v1619_v60 = vadd.f32 1.0, %v2470_v53  ;;  %v1622_v63 = vmul.f32 %v1618_v52, %v1590_v58  ;;  %v1781_v53 = vsub.s32 2, %v3557_v50 }
 0xb70   : > { %v1625_v62 = vmul.f32 %v1621_v57, %v1593_v56  ;;  %v1790_v58 = vrot.slane %v3561_v55, %v1789_v54 }
 0xb71   : > { %v1623_v0 = vmul.f32 %v1619_v60, %v1591_v59  ;;  %v1782_v56 = vrot.slane %v3561_v55, %v1781_v53 }
 0xb72   : > { %v1627_v1 = vpack.c.bf16 %v1625_v62, %v1624_v61 }
 0xb73   : > { %v1626_v2 = vpack.c.bf16 %v1623_v0, %v1622_v63 }
 0xb75   : > { %2273 = vmatprep.mubr.msk.bf16.mxu1 %vm1667_vm4, %v1626_v2 }
 0xb76   : > { %2274 = vmatmul.mubr.msk.bf16.vlgmr.msra.gmra.mrb[20].mxu1 %vm1667_vm4, %v1627_v1 }
 0xc49   : > { %v2275_v6 = vpop.f32.mrb[20].mxu1 }
 0xc4a   : > { %v1708_v7 = vpop.f32.mrb[21].mxu1  ;;  %v1717_v44 = vadd.f32 %v2275_v6, %v2126_v3 }
 0xc4b   : > { %v1709_v46 = vadd.f32 %v2126_v3, %v1708_v7  ;;  %v2276_v47 = vpop.f32.mrb[22].mxu1 }
 0xc4c   : > { %v1711_v38 = vpop.f32.mrb[23].mxu1  ;;  %v1720_v41 = vadd.f32 %v2276_v47, %v2126_v3  ;;  %v1725_v8 = vadd.f32 %v1717_v44, %v3573_v11 }
 0xc4d   : > { %v1712_v42 = vadd.f32 %v2126_v3, %v1711_v38  ;;  %v1723_v13 = vadd.f32 %v1709_v46, %v3566_v4 }
 0xc4e   : > { %v1726_v18 = vadd.f32 %v1720_v41, %v3575_v31  ;;  %v1733_v19 = vsel %vm775_vm1, %v1725_v8, 0.0 }
 0xc4f   : > { %v1727_v15 = vsel %vm775_vm1, %v1723_v13, 0.0  ;;  %v1724_v16 = vadd.f32 %v1712_v42, %v3568_v5 }
 0xc50   : > { %1728 = vadd.xlane.f32.xlu1 %v1727_v15  ;;  %v1736_v39 = vsel %vm775_vm1, %v1726_v18, 0.0 }
 0xc51   : > { %v1730_v17 = vsel %vm775_vm1, %v1724_v16, 0.0 }
 0xc52   : > { %1731 = vadd.xlane.f32.xlu0 %v1730_v17 }
 0xc54   : > { %1734 = vadd.xlane.f32.xlu1 %v1733_v19 }
 0xc56   : > { %1737 = vadd.xlane.f32.xlu0 %v1736_v39 }
 0xcdd   : > { %v1729_v9 = vpop.xlane.xlu1 %1728 }
 0xcde   : > { %v1739_v4 = vmul.f32 0.03125, %v1729_v9 }
 0xcdf   : > { %v1732_v20 = vpop.xlane.xlu0 %1731 }
 0xce0   : > { %v1743_v10 = vsub.f32 %v1723_v13, %v1739_v4  ;;  %v1740_v21 = vmul.f32 0.03125, %v1732_v20 }
 0xce1   : > { %v1735_v5 = vpop.xlane.xlu1 %1734 }
 0xce2   : > { %v1744_v22 = vsub.f32 %v1724_v16, %v1740_v21  ;;  %v1741_v11 = vmul.f32 0.03125, %v1735_v5  ;;  %v1747_v23 = vmul.f32 %v1743_v10, %v1743_v10 }
 0xce3   : > { %v1738_v26 = vpop.xlane.xlu0 %1737 }
 0xce4   : > { %v1745_v12 = vsub.f32 %v1725_v8, %v1741_v11  ;;  %v1742_v27 = vmul.f32 0.03125, %v1738_v26  ;;  %v1751_v31 = vsel %vm775_vm1, %v1747_v23, 0.0  ;;  %v1748_v28 = vmul.f32 %v1744_v22, %v1744_v22 }
 0xce5   : > { %1752 = vadd.xlane.f32.xlu1 %v1751_v31 }
 0xce6   : > { %v1746_v29 = vsub.f32 %v1726_v18, %v1742_v27  ;;  %v1754_v30 = vsel %vm775_vm1, %v1748_v28, 0.0  ;;  %v1749_v32 = vmul.f32 %v1745_v12, %v1745_v12 }
 0xce7   : > { %1755 = vadd.xlane.f32.xlu0 %v1754_v30 }
 0xce8   : > { %v1757_v33 = vsel %vm775_vm1, %v1749_v32, 0.0  ;;  %v1750_v34 = vmul.f32 %v1746_v29, %v1746_v29 }
 0xce9   : > { %1758 = vadd.xlane.f32.xlu1 %v1757_v33 }
 0xcea   : > { %v1760_v35 = vsel %vm775_vm1, %v1750_v34, 0.0 }
 0xceb   : > { %1761 = vadd.xlane.f32.xlu0 %v1760_v35 }
 0xd72   : > { %v1753_v36 = vpop.xlane.xlu1 %1752 }
 0xd73   : > { %v1763_v37 = vmul.f32 0.03125, %v1753_v36 }
 0xd74   : > { %v1756_v40 = vpop.xlane.xlu0 %1755 }
 0xd75   : > { %v1767_v25 = vadd.f32 1e-12, %v1763_v37  ;;  %v1764_v43 = vmul.f32 0.03125, %v1756_v40 }
 0xd76   : > { %v1759_v24 = vpop.xlane.xlu1 %1758 }
 0xd77   : > { %2471 = vrsqrt.f32 %v1767_v25  ;;  %v1768_v45 = vadd.f32 1e-12, %v1764_v43  ;;  %v1765_v48 = vmul.f32 0.03125, %v1759_v24 }
 0xd78   : > { %v1762_v49 = vpop.xlane.xlu0 %1761 }
 0xd79   : > { %2473 = vrsqrt.f32 %v1768_v45  ;;  %v1769_v14 = vadd.f32 1e-12, %v1765_v48  ;;  %v1766_v51 = vmul.f32 0.03125, %v1762_v49 }
 0xd7b   : > { %2475 = vrsqrt.f32 %v1769_v14  ;;  %v1770_v52 = vadd.f32 1e-12, %v1766_v51 }
 0xd7d   : > { %2477 = vrsqrt.f32 %v1770_v52 }
 0xd81   : > { %v2472_v57 = vpop.eup %2471 }
 0xd82   : > { %v1775_v59 = vmul.f32 %v2472_v57, %v1743_v10 }
 0xd83   : > { %v2474_v60 = vpop.eup %2473 }
 0xd84   : > { %v1783_v61 = vmul.f32 %v1782_v56, %v1775_v59  ;;  %v1776_v62 = vmul.f32 %v2474_v60, %v1744_v22 }
 0xd85   : > { %v2476_v63 = vpop.eup %2475 }
 0xd86   : > { %v1791_v0 = vadd.f32 %v1790_v58, %v1783_v61  ;;  %v1784_v1 = vmul.f32 %v1782_v56, %v1776_v62  ;;  %v1777_v2 = vmul.f32 %v2476_v63, %v1745_v12 }
 0xd87   : > { %v2478_v3 = vpop.eup %2477 }
 0xd88   : > { %1795 = vst.msk [vmem:[#allocation2] sm:$0xff] %vm775_vm1, %v1791_v0  ;;  %v1792_v6 = vadd.f32 %v1790_v58, %v1784_v1  ;;  %v1785_v7 = vmul.f32 %v1782_v56, %v1777_v2  ;;  %v1778_v44 = vmul.f32 %v2478_v3, %v1746_v29  ;;  %1802 = sbr.rel (%p2133_p0) target bundleno = 3473 (0xd91), region = 116  ;;  %v2146_v47 = vpack.c.bf16 (!%p2133_p0), %v1791_v0, %v1791_v0 }
 0xd8a   : > { %1796 = vst.msk [vmem:[#allocation2 + $0x8] sm:$0xff] %vm775_vm1, %v1792_v6  ;;  %v1793_v50 = vadd.f32 %v1790_v58, %v1785_v7  ;;  %v1786_v46 = vmul.f32 %v1782_v56, %v1778_v44  ;;  %v2147_v38 = vpack.c.bf16 (!%p2133_p0), %v1792_v6, %v1792_v6 }
 0xd8b   : > { %1820 = vst.msk [vmem:[#allocation17] sm:$0xf] (!%p2133_p0), %vm1819_vm5, %v2146_v47 }
 0xd8c   : > { %1797 = vst.msk [vmem:[#allocation2 + $0x10] sm:$0xff] %vm775_vm1, %v1793_v50  ;;  %v1794_v55 = vadd.f32 %v1790_v58, %v1786_v46  ;;  %v2148_v41 = vpack.c.bf16 (!%p2133_p0), %v1793_v50, %v1793_v50 }
 0xd8d   : > { %1821 = vst.msk [vmem:[#allocation17 + $0x4] sm:$0xf] (!%p2133_p0), %vm1819_vm5, %v2147_v38 }
 0xd8e   : > { %1798 = vst.msk [vmem:[#allocation2 + $0x18] sm:$0xff] %vm775_vm1, %v1794_v55  ;;  %v2149_v42 = vpack.c.bf16 (!%p2133_p0), %v1794_v55, %v1794_v55 }
 0xd8f   : > { %1822 = vst.msk [vmem:[#allocation17 + $0x8] sm:$0xf] %vm1819_vm5, %v2148_v41 }
 0xd90   : > { %1823 = vst.msk [vmem:[#allocation17 + $0xc] sm:$0xf] %vm1819_vm5, %v2149_v42 }
 0xd91 PF: > { %s3742_s28 = sld [smem:[#allocation26_spill]]  ;;  %s2918_s24 = smov [#allocation17]  }
 0xd92   : > { %s1834_s15 = sshll.u32 %s2918_s24, 4  ;;  %s1835_s15 = int_to_ptr.vmem [resolvable:$true] %s1834_s15 }
 0xd93   : > { %s2805_s4 = scalar_lea.vmem %s1835_s15, 256  ;;  %p2812_p5 = scmp.lt.s32.totalorder %s1835_s15, %s1835_s15 }
 0xd94   : > { %p2806_p1 = scmp.ne.s32.totalorder %s1835_s15, %s2805_s4  ;;  %p2813_p11 = scmp.lt.s32.totalorder %s2805_s4, %s2805_s4 }
 0xd96   : > { %p2814_p3 = por %p2813_p11, %p2812_p5 }
 0xd97   : > { %p2347_p7 = scmp.eq.s32.totalorder %s3742_s28, 1 }
 0xd99   : > { %p2807_p13 = pnand %p2806_p1, %p2347_p7 }
 0xd9b   : > { %p2808_p12 = pneg %p2807_p13 }
 0xd9d   : > { %p2815_p6 = pnand %p2814_p3, %p2808_p12 }
 0xd9f   : > { %2818 = shalt.err (!%p2815_p6)
}
 0xda0   : > { %s3743_s26 = sld [smem:[#allocation36_spill]] }
 0xda6   : > { %s2819_s10 = scalar_lea.hbm %s3743_s26, 256 }
 0xda7   : > { %p2820_p2 = scmp.ne.s32.totalorder %s3743_s26, %s2819_s10  ;;  %p2825_p10 = scmp.lt.u32.totalorder %s2819_s10, %s3743_s26 }
 0xda9   : > { %p2821_p8 = pnand %p2820_p2, %p2347_p7 }
 0xdab   : > { %p2822_p4 = pneg %p2821_p8 }
 0xdad   : > { %p2827_p9 = pnand %p2825_p10, %p2822_p4 }
 0xdaf   : > { %2830 = shalt.err (!%p2827_p9)
}
 0xdb0   : > { %s2919_s19 = smov 4  }
 0xdb1   : > { %2304 = dma.vmem_to_hbm [thread:$0]  (%p2347_p7), %s1835_s15, 256, %s3743_s26, [#allocation5], %s2913_s0, %s2913_s0, %s2919_s19  }
 0xdb2   : > { %2868 = dma.done.wait (%p2347_p7), [#allocation5], 256  }
 0xdb3   : > { %2870 = vsyncadd (%p2347_p7), [#allocation5], 4294967040 }
 0xdb4 PF: > { %s3744_s17 = sld [smem:[#allocation25_spill]]  ;;  %s3746_s18 = sld [smem:[#allocation23_spill]] }
 0xdb5   : > { %s3747_s19 = sld [smem:[#allocation30_spill]]  ;;  %s3748_s30 = sld [smem:[#allocation29_spill]] }
 0xdb6   : > { %s3749_s20 = smov %s2889_s21 }
 0xdba   : > { %s24_s22 = sadd.s32 1, %s3744_s17   ;;  %s3745_s17 = sld [smem:[#allocation22_spill]] }
 0xdbb   : > { %p21_p0 = scmp.ge.s32.totalorder %s24_s22, 4   ;;  %s3750_s21 = smov %s3748_s30 }
 0xdbd   :  { %23 = sbr.rel (!%p21_p0) target bundleno = 12 (0xc), region = 207 }
 0xdc4   :  { %1850 = vsyncpa [#allocation4], 1 }
 0xdc5   :  { %1852 = vsyncpa [#allocation4 + $0x1], 1 }
 0xdc6   :  { %1853 = vsyncpa [#allocation7], 1 }
 0xdc7   :  { %1854 = vsyncpa [#allocation5], 1 }
 0xdc8   :  { %1856 = vsyncpa [#allocation5 + $0x1], 1 }

</bundles_post_ra>
